<compile_context>
chip_gen: v6e
topology: v6e:2x2x1
jax: 0.10.0
libtpu: 0.0.40
codegen_flags: <defaults>
</compile_context>

<pallas_src>
import functools

import jax
import jax.numpy as jnp
import numpy as np
from jax.experimental import pallas as pl
from jax.experimental.pallas import tpu as pltpu

BN_EPS = 1e-5


# ---------------------------------------------------------------------------
# Kernels
# ---------------------------------------------------------------------------

def _fc_kernel(z_ref, w1_ref, b1_ref, w2_ref, b2_ref, o_ref):
    """o = relu(relu(z @ w1 + b1) @ w2 + b2).

    w2/b2 columns are pre-permuted so the output is already in NHWC (y, x, c)
    order: this absorbs Unflatten2D and the NCHW->NHWC boundary transpose.
    The module's trailing nn.ReLU() after Unflatten2D is a no-op here."""
    h = jnp.maximum(
        jnp.dot(z_ref[...], w1_ref[...], preferred_element_type=jnp.float32)
        + b1_ref[...], 0.0)
    o_ref[...] = jnp.maximum(
        jnp.dot(h, w2_ref[...], preferred_element_type=jnp.float32)
        + b2_ref[...], 0.0)


def _make_convt_kernel(H, W, Cin, Cout, *, compute_stats, final_sigmoid):
    """Fused kernel for one decoder conv layer (one sample per grid step):

      [prev-layer BN scale/shift + ReLU on the input tile]
      -> ConvTranspose2d(k=4, s=2, p=1, bias=False)  (single MXU contraction)
      -> [Sigmoid]                      (final layer)
      -> [per-sample BatchNorm partial statistics]    (hidden layers)

    x_ref     : (1, H, W*Cin)    pre-BN input, lanes ordered (w, cin)
    scale_ref : (1, W*Cin)       per-channel BN scale tiled over w (ones for
    shift_ref : (1, W*Cin)       the first conv layer; zeros resp.)
    w_ref     : (3*(W+2)*Cin, 4*W*Cout)  fused RHS (all 4 stride-2 phases)
    [sel_ref  : (4*W*Cout, Cout), selt_ref: (Cout, 4*W*Cout)]  0/1 selectors
    y_ref     : (1, H, 4*W*Cout) pre-BN conv output, lanes (py, 2x+px, cout)
    [stats_ref: (1, 2, Cout)]    per-sample [sum, centered sum-of-squares]
    xpad      : (H+2, W*Cin)     VMEM scratch holding the row halo
    """
    Nc = 4 * W * Cout
    cnt = float(4 * H * W)          # per-sample, per-channel output count

    def kernel(*refs):
        if compute_stats:
            (x_ref, scale_ref, shift_ref, w_ref, sel_ref, selt_ref,
             y_ref, stats_ref, xpad) = refs
        else:
            x_ref, scale_ref, shift_ref, w_ref, y_ref, xpad = refs

        # Previous layer's BatchNorm + ReLU fused here so the post-BN
        # activation never round-trips through HBM.  The halo must be zero in
        # POST-BN space, so transform first, pad afterwards.
        xt = jnp.maximum(x_ref[0] * scale_ref[...] + shift_ref[...], 0.0)

        xpad[...] = jnp.zeros_like(xpad)          # zero row halo
        xpad[1:H + 1, :] = xt

        # im2row: per output-row block i, the 3-row x (W+2)-col halo window
        # laid out along lanes (dy, jc, cin).  Column halo comes from zero
        # lane blocks -> only lane-dim concatenations (no relayouts).
        zc = jnp.zeros((H, Cin), jnp.float32)
        pieces = []
        for dy in range(3):
            pieces += [zc, xpad[dy:dy + H, :], zc]
        lhs = jnp.concatenate(pieces, axis=1)                 # (H, 3*(W+2)*Cin)

        # One MXU contraction produces all four stride-2 output phases.
        out = jnp.dot(lhs, w_ref[...],
                      preferred_element_type=jnp.float32)     # (H, 4*W*Cout)
        if final_sigmoid:
            out = jax.nn.sigmoid(out)
        y_ref[0] = out        # lane-dense store; free reshape to NHWC outside

        if compute_stats:
            # Per-channel sum and CENTERED sum-of-squares via tiny 0/1
            # selector matmuls (avoids lane<->sublane reshapes and the
            # E[x^2]-E[x]^2 cancellation flagged in review).
            colsum = jnp.sum(out, axis=0, keepdims=True)                 # (1, Nc)
            s1 = jnp.dot(colsum, sel_ref[...],
                         preferred_element_type=jnp.float32)             # (1, Cout)
            mean = s1 * (1.0 / cnt)
            mean_l = jnp.dot(mean, selt_ref[...],
                             preferred_element_type=jnp.float32)         # (1, Nc)
            d = out - mean_l
            m2 = jnp.dot(jnp.sum(d * d, axis=0, keepdims=True), sel_ref[...],
                         preferred_element_type=jnp.float32)             # (1, Cout)
            stats_ref[0] = jnp.concatenate([s1, m2], axis=0)             # (2, Cout)

    return kernel


# ---------------------------------------------------------------------------
# Host-side weight packing
# ---------------------------------------------------------------------------

def _fused_conv_weight(w_t, W):
    """nn.ConvTranspose2d weight (Cin, Cout, 4, 4) -> fused RHS of shape
    (3*(W+2)*Cin, 4*W*Cout).

    K lanes:  (dy, jc, cin) with dy in [0,3) the row offset inside the 3-row
              halo window and jc in [0, W+2) the padded column.
    N lanes:  (py, 2*j+px, cout) -> output row 2*i+py, column 2*j+px.
    Zero entries encode taps that do not contribute to a given phase (FLOP
    inflation is irrelevant at these sizes; it buys a single matmul/sample)."""
    w_t = np.asarray(w_t, np.float32)
    Cin, Cout, KH, KW = w_t.shape
    assert KH == 4 and KW == 4
    Wp = W + 2
    w = np.zeros((3, Wp, Cin, 2, 2 * W, Cout), np.float32)
    for p in range(2):
        for dy in range(3):
            ky = 3 + p - 2 * dy
            if not 0 <= ky < KH:
                continue
            for px in range(2):
                for j in range(W):
                    for jc in range(Wp):
                        kx = 3 + px + 2 * j - 2 * jc
                        if not 0 <= kx < KW:
                            continue
                        w[dy, jc, :, p, 2 * j + px, :] = w_t[:, :, ky, kx]
    return jnp.asarray(w.reshape(3 * Wp * Cin, 4 * W * Cout))


def prepare_params(params, c0, h0, w0):
    """One-time host-side packing of the PyTorch-layout weights."""
    n_pix = c0 * h0 * w0
    # Permute second FC layer columns so its output is already NHWC.
    perm = np.arange(n_pix).reshape(c0, h0, w0).transpose(1, 2, 0).reshape(-1)
    fc2_w = np.asarray(params["fc2_w"], np.float32)[:, perm]
    fc2_b = np.asarray(params["fc2_b"], np.float32)[perm]
    prep = {
        "fc": (jnp.asarray(params["fc1_w"], dtype=jnp.float32),
               jnp.asarray(params["fc1_b"], dtype=jnp.float32).reshape(1, -1),
               jnp.asarray(fc2_w),
               jnp.asarray(fc2_b).reshape(1, -1)),
        "layers": [],
    }
    H, W = h0, w0
    for (w_t, gamma, beta) in params["conv_layers"]:
        Cout = int(w_t.shape[1])
        sel = np.tile(np.eye(Cout, dtype=np.float32), (4 * W, 1))
        prep["layers"].append({
            "w": _fused_conv_weight(w_t, W),
            "gamma": jnp.asarray(gamma, dtype=jnp.float32),
            "beta": jnp.asarray(beta, dtype=jnp.float32),
            "sel": jnp.asarray(sel),
            "selt": jnp.asarray(np.ascontiguousarray(sel.T)),
        })
        H, W = 2 * H, 2 * W
    prep["final_w"] = _fused_conv_weight(params["final_w"], W)
    return prep


# ---------------------------------------------------------------------------
# Pallas wrappers
# ---------------------------------------------------------------------------

def _convt_layer(x_pre, scale_c, shift_c, w_fused, sel, selt,
                 H, W, Cin, Cout, *, final_sigmoid):
    """One fused pallas_call per layer.  Grid over the batch, "parallel" so
    v7x's two TensorCores split it (N=2 -> 2 grid steps).  For larger N one
    would pack several samples per step to raise the matmul M occupancy."""
    N = x_pre.shape[0]
    K = 3 * (W + 2) * Cin
    Nc = 4 * W * Cout
    compute_stats = sel is not None

    scale_row = jnp.tile(scale_c, W).reshape(1, W * Cin)
    shift_row = jnp.tile(shift_c, W).reshape(1, W * Cin)

    in_specs = [
        pl.BlockSpec((1, H, W * Cin), lambda n: (n, 0, 0)),
        pl.BlockSpec((1, W * Cin), lambda n: (0, 0)),
        pl.BlockSpec((1, W * Cin), lambda n: (0, 0)),
        pl.BlockSpec((K, Nc), lambda n: (0, 0)),
    ]
    inputs = [x_pre, scale_row, shift_row, w_fused]
    out_shape = [jax.ShapeDtypeStruct((N, H, Nc), jnp.float32)]
    out_specs = [pl.BlockSpec((1, H, Nc), lambda n: (n, 0, 0))]
    if compute_stats:
        in_specs += [pl.BlockSpec((Nc, Cout), lambda n: (0, 0)),
                     pl.BlockSpec((Cout, Nc), lambda n: (0, 0))]
        inputs += [sel, selt]
        out_shape.append(jax.ShapeDtypeStruct((N, 2, Cout), jnp.float32))
        out_specs.append(pl.BlockSpec((1, 2, Cout), lambda n: (n, 0, 0)))

    kernel = _make_convt_kernel(H, W, Cin, Cout,
                                compute_stats=compute_stats,
                                final_sigmoid=final_sigmoid)
    res = pl.pallas_call(
        kernel,
        out_shape=tuple(out_shape),
        grid_spec=pltpu.PrefetchScalarGridSpec(
            num_scalar_prefetch=0,
            grid=(N,),
            in_specs=in_specs,
            out_specs=out_specs,
            scratch_shapes=[pltpu.VMEM((H + 2, W * Cin), jnp.float32)]),
        compiler_params=pltpu.CompilerParams(
            dimension_semantics=("parallel",)),
    )(*inputs)
    if compute_stats:
        return res[0], res[1]
    return res[0]


@functools.partial(jax.jit, static_argnums=(2, 3, 4))
def vae_decoder_forward(prep, z, c0, h0, w0):
    """VAE_Decoder.forward (latent_dim=1).  z: (N, latent_size) -> (N, C, H, W)."""
    N = z.shape[0]
    n_pix = c0 * h0 * w0
    w1, b1, w2, b2 = prep["fc"]

    # Fused Linear -> ReLU -> Linear -> ReLU (+ Unflatten2D in NHWC order).
    a0 = pl.pallas_call(
        _fc_kernel,
        out_shape=jax.ShapeDtypeStruct((N, n_pix), jnp.float32),
        in_specs=[pl.BlockSpec(memory_space=pltpu.MemorySpace.VMEM)] * 5,
        out_specs=pl.BlockSpec(memory_space=pltpu.MemorySpace.VMEM),
    )(z.astype(jnp.float32), w1, b1, w2, b2)

    H, W, Cin = h0, w0, c0
    x_pre = a0.reshape(N, H, W * Cin)            # NHWC rows x (w, c) lanes; free
    scale_c = jnp.ones((Cin,), jnp.float32)      # first conv input is already final
    shift_c = jnp.zeros((Cin,), jnp.float32)

    for layer in prep["layers"]:
        Cout = layer["sel"].shape[1]
        y_pre, stats = _convt_layer(x_pre, scale_c, shift_c, layer["w"],
                                    layer["sel"], layer["selt"],
                                    H, W, Cin, Cout, final_sigmoid=False)
        # Combine per-sample (sum, centered-M2) partials into the batch mean /
        # biased variance (parallel-variance combination; O(Cout) math).
        cnt = 4.0 * H * W
        total = float(N) * cnt
        s1, m2 = stats[:, 0, :], stats[:, 1, :]
        mean = jnp.sum(s1, axis=0) / total
        m2_tot = jnp.sum(m2, axis=0) + cnt * jnp.sum((s1 / cnt - mean) ** 2, axis=0)
        inv_std = jax.lax.rsqrt(m2_tot / total + BN_EPS)
        scale_c = layer["gamma"] * inv_std
        shift_c = layer["beta"] - mean * scale_c
        # Next layer geometry; (N, H, 4*W*Cout) is a free reshape away from
        # NHWC (N, 2H, 2W, Cout) -> no transposes / extra HBM passes between layers.
        H, W, Cin = 2 * H, 2 * W, Cout
        x_pre = y_pre.reshape(N, H, W * Cin)

    # Final layer: last BN + ReLU applied in-kernel, conv-transpose, sigmoid.
    w_final = prep["final_w"]
    Cout = w_final.shape[1] // (4 * W)
    y = _convt_layer(x_pre, scale_c, shift_c, w_final, None, None,
                     H, W, Cin, Cout, final_sigmoid=True)
    y = y.reshape(N, 2 * H, 2 * W, Cout)
    return jnp.transpose(y, (0, 3, 1, 2))        # NCHW at the model boundary


# ---------------------------------------------------------------------------
# Independent NumPy reference
# ---------------------------------------------------------------------------

def _np_convT_4s2p1(x, w):
    """Explicit scatter form of ConvTranspose2d(k=4, s=2, p=1, bias=False)."""
    x = np.asarray(x, np.float64)
    w = np.asarray(w, np.float64)
    N, Cin, H, W = x.shape
    _, Cout, KH, KW = w.shape
    Ho, Wo = 2 * H, 2 * W
    out = np.zeros((N, Cout, Ho, Wo), np.float64)
    for iy in range(H):
        for ix in range(W):
            contrib = np.einsum("nc,cdkl->ndkl", x[:, :, iy, ix], w)
            for ky in range(KH):
                oy = iy * 2 + ky - 1
                if not (0 <= oy < Ho):
                    continue
                for kx in range(KW):
                    ox = ix * 2 + kx - 1
                    if 0 <= ox < Wo:
                        out[:, :, oy, ox] += contrib[:, :, ky, kx]
    return out


def reference_forward(params, z, c0, h0, w0):
    def lin_relu(x, w, b):
        return np.maximum(x @ np.asarray(w, np.float64)
                          + np.asarray(b, np.float64), 0.0)

    h = lin_relu(np.asarray(z, np.float64), params["fc1_w"], params["fc1_b"])
    h = lin_relu(h, params["fc2_w"], params["fc2_b"])
    x = h.reshape(h.shape[0], c0, h0, w0)
    for w_t, gamma, beta in params["conv_layers"]:
        y = _np_convT_4s2p1(x, w_t)
        mean = y.mean(axis=(0, 2, 3), keepdims=True)
        var = y.var(axis=(0, 2, 3), keepdims=True)   # biased (training-mode BN)
        y = (y - mean) / np.sqrt(var + BN_EPS)
        y = (y * np.asarray(gamma, np.float64).reshape(1, -1, 1, 1)
             + np.asarray(beta, np.float64).reshape(1, -1, 1, 1))
        x = np.maximum(y, 0.0)
    y = _np_convT_4s2p1(x, params["final_w"])
    return 1.0 / (1.0 + np.exp(-y))


# ---------------------------------------------------------------------------
# Main
# ---------------------------------------------------------------------------

if __name__ == "__main__":
    # Small VAE_Decoder configuration (latent_dim=1):
    #   input_shape=(1,16,16), latent_size=8, n_conv=3, last_layer_channels=8,
    #   feature_size=32, batch=2.
    N = 2
    input_c, input_h, input_w = 1, 16, 16
    latent_size, feature_size = 8, 32
    n_conv, llc = 3, 8

    c0 = llc * 2 ** (n_conv - 1)            # 32 channels after Unflatten2D
    h0 = input_h // 2 ** n_conv             # 2
    w0 = input_w // 2 ** n_conv             # 2
    n_pix = c0 * h0 * w0                    # 128

    key = jax.random.PRNGKey(0)
    ks = list(jax.random.split(key, 16))

    def uinit(k, shape, fan_in):
        bound = 1.0 / np.sqrt(fan_in)
        return jax.random.uniform(k, shape, jnp.float32, minval=-bound, maxval=bound)

    conv_layers = []
    chans = [llc * 2 ** i for i in range(n_conv - 1, -1, -1)]    # [32, 16, 8]
    kidx = 4
    for li in range(n_conv - 1):
        cin, cout = chans[li], chans[li + 1]
        w_t = uinit(ks[kidx], (cin, cout, 4, 4), cin * 16); kidx += 1
        gamma = 1.0 + 0.1 * jax.random.normal(ks[kidx], (cout,), jnp.float32); kidx += 1
        beta = 0.1 * jax.random.normal(ks[kidx], (cout,), jnp.float32); kidx += 1
        conv_layers.append((w_t, gamma, beta))

    params = {
        "fc1_w": uinit(ks[0], (latent_size, feature_size), latent_size),
        "fc1_b": uinit(ks[1], (feature_size,), latent_size),
        "fc2_w": uinit(ks[2], (feature_size, n_pix), feature_size),
        "fc2_b": uinit(ks[3], (n_pix,), feature_size),
        "conv_layers": conv_layers,
        "final_w": uinit(ks[kidx], (llc, input_c, 4, 4), llc * 16),
    }
    z = jax.random.normal(ks[15], (N, latent_size), jnp.float32)

    prep = prepare_params(params, c0, h0, w0)
    out = jax.block_until_ready(vae_decoder_forward(prep, z, c0, h0, w0))
    assert out.shape == (N, input_c, input_h, input_w), out.shape

    params_np = jax.tree_util.tree_map(np.asarray, params)
    ref = reference_forward(params_np, np.asarray(z), c0, h0, w0)
    np.testing.assert_allclose(np.asarray(out), ref, rtol=1e-3, atol=1e-3)

    print("KERNEL_OK")
</pallas_src>

<mosaic_0001>
module attributes {stable_mosaic.version = 11 : i64} {
  func.func @_fc_kernel(%arg0: memref<2x8xf32, #tpu.memory_space<vmem>>, %arg1: memref<8x32xf32, #tpu.memory_space<vmem>>, %arg2: memref<1x32xf32, #tpu.memory_space<vmem>>, %arg3: memref<32x128xf32, #tpu.memory_space<vmem>>, %arg4: memref<1x128xf32, #tpu.memory_space<vmem>>, %arg5: memref<2x128xf32, #tpu.memory_space<vmem>>) attributes {dimension_semantics = [], scalar_prefetch = 0 : i64, scratch_operands = 0 : i64, tpu.core_type = #tpu.core_type<tc>} {
    %c0 = arith.constant 0 : index
    %c0_0 = arith.constant 0 : index
    %0 = vector.load %arg0[%c0, %c0_0] : memref<2x8xf32, #tpu.memory_space<vmem>>, vector<2x8xf32>
    %c0_1 = arith.constant 0 : index
    %c0_2 = arith.constant 0 : index
    %1 = vector.load %arg1[%c0_1, %c0_2] : memref<8x32xf32, #tpu.memory_space<vmem>>, vector<8x32xf32>
    %cst = arith.constant dense<0.000000e+00> : vector<2x32xf32>
    %2 = tpu.matmul %0, %1, %cst {dimension_numbers = #tpu.dot_dimension_numbers<[1], [0], [0], [1], [0, 0, 1, 1], [], []>} : vector<2x8xf32>, vector<8x32xf32>, vector<2x32xf32> -> vector<2x32xf32>
    %c0_3 = arith.constant 0 : index
    %c0_4 = arith.constant 0 : index
    %3 = vector.load %arg2[%c0_3, %c0_4] : memref<1x32xf32, #tpu.memory_space<vmem>>, vector<1x32xf32>
    %4 = vector.broadcast %3 : vector<1x32xf32> to vector<2x32xf32>
    %5 = arith.addf %2, %4 : vector<2x32xf32>
    %cst_5 = arith.constant 0.000000e+00 : f32
    %6 = vector.broadcast %cst_5 : f32 to vector<2x32xf32>
    %7 = arith.maximumf %5, %6 : vector<2x32xf32>
    %c0_6 = arith.constant 0 : index
    %c0_7 = arith.constant 0 : index
    %8 = vector.load %arg3[%c0_6, %c0_7] : memref<32x128xf32, #tpu.memory_space<vmem>>, vector<32x128xf32>
    %cst_8 = arith.constant dense<0.000000e+00> : vector<2x128xf32>
    %9 = tpu.matmul %7, %8, %cst_8 {dimension_numbers = #tpu.dot_dimension_numbers<[1], [0], [0], [1], [0, 0, 1, 1], [], []>} : vector<2x32xf32>, vector<32x128xf32>, vector<2x128xf32> -> vector<2x128xf32>
    %c0_9 = arith.constant 0 : index
    %c0_10 = arith.constant 0 : index
    %10 = vector.load %arg4[%c0_9, %c0_10] : memref<1x128xf32, #tpu.memory_space<vmem>>, vector<1x128xf32>
    %11 = vector.broadcast %10 : vector<1x128xf32> to vector<2x128xf32>
    %12 = arith.addf %9, %11 : vector<2x128xf32>
    %cst_11 = arith.constant 0.000000e+00 : f32
    %13 = vector.broadcast %cst_11 : f32 to vector<2x128xf32>
    %14 = arith.maximumf %12, %13 : vector<2x128xf32>
    %c0_12 = arith.constant 0 : index
    %c0_13 = arith.constant 0 : index
    %15 = vector.load %arg5[%c0_12, %c0_13] : memref<2x128xf32, #tpu.memory_space<vmem>>, vector<2x128xf32>
    tpu.vector_store %arg5[%c0_12, %c0_13], %14 {strides = array<i32>} : memref<2x128xf32, #tpu.memory_space<vmem>>, vector<2x128xf32>,
    return
  }
}

module attributes {stable_mosaic.version = 11 : i64} {
  func.func @kernel(%arg0: i32, %arg1: memref<1x2x64xf32, #tpu.memory_space<vmem>>, %arg2: memref<1x64xf32, #tpu.memory_space<vmem>>, %arg3: memref<1x64xf32, #tpu.memory_space<vmem>>, %arg4: memref<384x128xf32, #tpu.memory_space<vmem>>, %arg5: memref<128x16xf32, #tpu.memory_space<vmem>>, %arg6: memref<16x128xf32, #tpu.memory_space<vmem>>, %arg7: memref<1x2x128xf32, #tpu.memory_space<vmem>>, %arg8: memref<1x2x16xf32, #tpu.memory_space<vmem>>, %arg9: memref<4x64xf32, #tpu.memory_space<vmem>>) attributes {dimension_semantics = [#tpu.dimension_semantics<parallel>], iteration_bounds = array<i64: 2>, scalar_prefetch = 0 : i64, scratch_operands = 1 : i64, tpu.core_type = #tpu.core_type<tc>, window_params = [{transform_indices = @transform_0, window_bounds = array<i64: 1, 2, 64>}, {pipeline_mode = #tpu.pipeline_mode<synchronous>, transform_indices = @transform_1, window_bounds = array<i64: 1, 64>}, {pipeline_mode = #tpu.pipeline_mode<synchronous>, transform_indices = @transform_2, window_bounds = array<i64: 1, 64>}, {pipeline_mode = #tpu.pipeline_mode<synchronous>, transform_indices = @transform_3, window_bounds = array<i64: 384, 128>}, {pipeline_mode = #tpu.pipeline_mode<synchronous>, transform_indices = @transform_4, window_bounds = array<i64: 128, 16>}, {pipeline_mode = #tpu.pipeline_mode<synchronous>, transform_indices = @transform_5, window_bounds = array<i64: 16, 128>}, {transform_indices = @transform_6, window_bounds = array<i64: 1, 2, 128>}, {transform_indices = @transform_7, window_bounds = array<i64: 1, 2, 16>}]} {
    %c0 = arith.constant 0 : index
    %c0_0 = arith.constant 0 : index
    %c0_1 = arith.constant 0 : index
    %0 = vector.load %arg1[%c0, %c0_0, %c0_1] : memref<1x2x64xf32, #tpu.memory_space<vmem>>, vector<1x2x64xf32>
    %1 = vector.shape_cast %0 : vector<1x2x64xf32> to vector<2x64xf32>
    %c0_2 = arith.constant 0 : index
    %c0_3 = arith.constant 0 : index
    %2 = vector.load %arg2[%c0_2, %c0_3] : memref<1x64xf32, #tpu.memory_space<vmem>>, vector<1x64xf32>
    %3 = vector.broadcast %2 : vector<1x64xf32> to vector<2x64xf32>
    %4 = arith.mulf %1, %3 : vector<2x64xf32>
    %c0_4 = arith.constant 0 : index
    %c0_5 = arith.constant 0 : index
    %5 = vector.load %arg3[%c0_4, %c0_5] : memref<1x64xf32, #tpu.memory_space<vmem>>, vector<1x64xf32>
    %6 = vector.broadcast %5 : vector<1x64xf32> to vector<2x64xf32>
    %7 = arith.addf %4, %6 : vector<2x64xf32>
    %cst = arith.constant 0.000000e+00 : f32
    %8 = vector.broadcast %cst : f32 to vector<2x64xf32>
    %9 = arith.maximumf %7, %8 : vector<2x64xf32>
    %cst_6 = arith.constant 0.000000e+00 : f32
    %10 = vector.broadcast %cst_6 : f32 to vector<4x64xf32>
    %c0_7 = arith.constant 0 : index
    %c0_8 = arith.constant 0 : index
    %11 = vector.load %arg9[%c0_7, %c0_8] : memref<4x64xf32, #tpu.memory_space<vmem>>, vector<4x64xf32>
    tpu.vector_store %arg9[%c0_7, %c0_8], %10 {strides = array<i32>} : memref<4x64xf32, #tpu.memory_space<vmem>>, vector<4x64xf32>,
    %c1 = arith.constant 1 : index
    %c0_9 = arith.constant 0 : index
    %12 = vector.load %arg9[%c1, %c0_9] : memref<4x64xf32, #tpu.memory_space<vmem>>, vector<2x64xf32>
    tpu.vector_store %arg9[%c1, %c0_9], %9 {strides = array<i32>} : memref<4x64xf32, #tpu.memory_space<vmem>>, vector<2x64xf32>,
    %cst_10 = arith.constant 0.000000e+00 : f32
    %13 = vector.broadcast %cst_10 : f32 to vector<2x32xf32>
    %c0_11 = arith.constant 0 : index
    %c0_12 = arith.constant 0 : index
    %14 = vector.load %arg9[%c0_11, %c0_12] : memref<4x64xf32, #tpu.memory_space<vmem>>, vector<2x64xf32>
    %c1_13 = arith.constant 1 : index
    %c0_14 = arith.constant 0 : index
    %15 = vector.load %arg9[%c1_13, %c0_14] : memref<4x64xf32, #tpu.memory_space<vmem>>, vector<2x64xf32>
    %c2 = arith.constant 2 : index
    %c0_15 = arith.constant 0 : index
    %16 = vector.load %arg9[%c2, %c0_15] : memref<4x64xf32, #tpu.memory_space<vmem>>, vector<2x64xf32>
    %17 = tpu.concatenate %13, %14, %13, %13, %15, %13, %13, %16, %13 in 1 : vector<2x32xf32>, vector<2x64xf32>, vector<2x32xf32>, vector<2x32xf32>, vector<2x64xf32>, vector<2x32xf32>, vector<2x32xf32>, vector<2x64xf32>, vector<2x32xf32> -> vector<2x384xf32>
    %c0_16 = arith.constant 0 : index
    %c0_17 = arith.constant 0 : index
    %18 = vector.load %arg4[%c0_16, %c0_17] : memref<384x128xf32, #tpu.memory_space<vmem>>, vector<384x128xf32>
    %cst_18 = arith.constant dense<0.000000e+00> : vector<2x128xf32>
    %19 = tpu.matmul %17, %18, %cst_18 {dimension_numbers = #tpu.dot_dimension_numbers<[1], [0], [0], [1], [0, 0, 1, 1], [], []>} : vector<2x384xf32>, vector<384x128xf32>, vector<2x128xf32> -> vector<2x128xf32>
    %c0_19 = arith.constant 0 : index
    %c0_20 = arith.constant 0 : index
    %c0_21 = arith.constant 0 : index
    %20 = vector.load %arg7[%c0_19, %c0_20, %c0_21] : memref<1x2x128xf32, #tpu.memory_space<vmem>>, vector<1x2x128xf32>
    %21 = vector.shape_cast %20 : vector<1x2x128xf32> to vector<2x128xf32>
    %22 = vector.shape_cast %19 : vector<2x128xf32> to vector<1x2x128xf32>
    tpu.vector_store %arg7[%c0_19, %c0_20, %c0_21], %22 {strides = array<i32>} : memref<1x2x128xf32, #tpu.memory_space<vmem>>, vector<1x2x128xf32>,
    %cst_22 = arith.constant dense<0.000000e+00> : vector<128xf32>
    %23 = vector.multi_reduction <add>, %19, %cst_22 [0] : vector<2x128xf32> to vector<128xf32>
    %24 = vector.shape_cast %23 : vector<128xf32> to vector<1x128xf32>
    %c0_23 = arith.constant 0 : index
    %c0_24 = arith.constant 0 : index
    %25 = vector.load %arg5[%c0_23, %c0_24] : memref<128x16xf32, #tpu.memory_space<vmem>>, vector<128x16xf32>
    %cst_25 = arith.constant dense<0.000000e+00> : vector<1x16xf32>
    %26 = tpu.matmul %24, %25, %cst_25 {dimension_numbers = #tpu.dot_dimension_numbers<[1], [0], [0], [1], [0, 0, 1, 1], [], []>} : vector<1x128xf32>, vector<128x16xf32>, vector<1x16xf32> -> vector<1x16xf32>
    %cst_26 = arith.constant 6.250000e-02 : f32
    %27 = vector.broadcast %cst_26 : f32 to vector<1x16xf32>
    %28 = arith.mulf %26, %27 : vector<1x16xf32>
    %c0_27 = arith.constant 0 : index
    %c0_28 = arith.constant 0 : index
    %29 = vector.load %arg6[%c0_27, %c0_28] : memref<16x128xf32, #tpu.memory_space<vmem>>, vector<16x128xf32>
    %cst_29 = arith.constant dense<0.000000e+00> : vector<1x128xf32>
    %30 = tpu.matmul %28, %29, %cst_29 {dimension_numbers = #tpu.dot_dimension_numbers<[1], [0], [0], [1], [0, 0, 1, 1], [], []>} : vector<1x16xf32>, vector<16x128xf32>, vector<1x128xf32> -> vector<1x128xf32>
    %31 = vector.broadcast %30 : vector<1x128xf32> to vector<2x128xf32>
    %32 = arith.subf %19, %31 : vector<2x128xf32>
    %33 = arith.mulf %32, %32 : vector<2x128xf32>
    %cst_30 = arith.constant dense<0.000000e+00> : vector<128xf32>
    %34 = vector.multi_reduction <add>, %33, %cst_30 [0] : vector<2x128xf32> to vector<128xf32>
    %35 = vector.shape_cast %34 : vector<128xf32> to vector<1x128xf32>
    %c0_31 = arith.constant 0 : index
    %c0_32 = arith.constant 0 : index
    %36 = vector.load %arg5[%c0_31, %c0_32] : memref<128x16xf32, #tpu.memory_space<vmem>>, vector<128x16xf32>
    %cst_33 = arith.constant dense<0.000000e+00> : vector<1x16xf32>
    %37 = tpu.matmul %35, %36, %cst_33 {dimension_numbers = #tpu.dot_dimension_numbers<[1], [0], [0], [1], [0, 0, 1, 1], [], []>} : vector<1x128xf32>, vector<128x16xf32>, vector<1x16xf32> -> vector<1x16xf32>
    %38 = tpu.concatenate %26, %37 in 0 : vector<1x16xf32>, vector<1x16xf32> -> vector<2x16xf32>
    %c0_34 = arith.constant 0 : index
    %c0_35 = arith.constant 0 : index
    %c0_36 = arith.constant 0 : index
    %39 = vector.load %arg8[%c0_34, %c0_35, %c0_36] : memref<1x2x16xf32, #tpu.memory_space<vmem>>, vector<1x2x16xf32>
    %40 = vector.shape_cast %39 : vector<1x2x16xf32> to vector<2x16xf32>
    %41 = vector.shape_cast %38 : vector<2x16xf32> to vector<1x2x16xf32>
    tpu.vector_store %arg8[%c0_34, %c0_35, %c0_36], %41 {strides = array<i32>} : memref<1x2x16xf32, #tpu.memory_space<vmem>>, vector<1x2x16xf32>,
    return
  }
  func.func @transform_0(%arg0: i32) -> (i32, i32, i32) {
    %c0_i32 = arith.constant 0 : i32
    %c0_i32_0 = arith.constant 0 : i32
    %c0_i32_1 = arith.constant 0 : i32
    return %arg0, %c0_i32, %c0_i32_0 : i32, i32, i32
  }
  func.func @transform_1(%arg0: i32) -> (i32, i32) {
    %c0_i32 = arith.constant 0 : i32
    %c0_i32_0 = arith.constant 0 : i32
    %c0_i32_1 = arith.constant 0 : i32
    return %c0_i32, %c0_i32_0 : i32, i32
  }
  func.func @transform_2(%arg0: i32) -> (i32, i32) {
    %c0_i32 = arith.constant 0 : i32
    %c0_i32_0 = arith.constant 0 : i32
    %c0_i32_1 = arith.constant 0 : i32
    return %c0_i32, %c0_i32_0 : i32, i32
  }
  func.func @transform_3(%arg0: i32) -> (i32, i32) {
    %c0_i32 = arith.constant 0 : i32
    %c0_i32_0 = arith.constant 0 : i32
    %c0_i32_1 = arith.constant 0 : i32
    return %c0_i32, %c0_i32_0 : i32, i32
  }
  func.func @transform_4(%arg0: i32) -> (i32, i32) {
    %c0_i32 = arith.constant 0 : i32
    %c0_i32_0 = arith.constant 0 : i32
    %c0_i32_1 = arith.constant 0 : i32
    return %c0_i32, %c0_i32_0 : i32, i32
  }
  func.func @transform_5(%arg0: i32) -> (i32, i32) {
    %c0_i32 = arith.constant 0 : i32
    %c0_i32_0 = arith.constant 0 : i32
    %c0_i32_1 = arith.constant 0 : i32
    return %c0_i32, %c0_i32_0 : i32, i32
  }
  func.func @transform_6(%arg0: i32) -> (i32, i32, i32) {
    %c0_i32 = arith.constant 0 : i32
    %c0_i32_0 = arith.constant 0 : i32
    %c0_i32_1 = arith.constant 0 : i32
    return %arg0, %c0_i32, %c0_i32_0 : i32, i32, i32
  }
  func.func @transform_7(%arg0: i32) -> (i32, i32, i32) {
    %c0_i32 = arith.constant 0 : i32
    %c0_i32_0 = arith.constant 0 : i32
    %c0_i32_1 = arith.constant 0 : i32
    return %arg0, %c0_i32, %c0_i32_0 : i32, i32, i32
  }
}

module attributes {stable_mosaic.version = 11 : i64} {
  func.func @kernel(%arg0: i32, %arg1: memref<1x4x64xf32, #tpu.memory_space<vmem>>, %arg2: memref<1x64xf32, #tpu.memory_space<vmem>>, %arg3: memref<1x64xf32, #tpu.memory_space<vmem>>, %arg4: memref<288x128xf32, #tpu.memory_space<vmem>>, %arg5: memref<128x8xf32, #tpu.memory_space<vmem>>, %arg6: memref<8x128xf32, #tpu.memory_space<vmem>>, %arg7: memref<1x4x128xf32, #tpu.memory_space<vmem>>, %arg8: memref<1x2x8xf32, #tpu.memory_space<vmem>>, %arg9: memref<6x64xf32, #tpu.memory_space<vmem>>) attributes {dimension_semantics = [#tpu.dimension_semantics<parallel>], iteration_bounds = array<i64: 2>, scalar_prefetch = 0 : i64, scratch_operands = 1 : i64, tpu.core_type = #tpu.core_type<tc>, window_params = [{transform_indices = @transform_0, window_bounds = array<i64: 1, 4, 64>}, {pipeline_mode = #tpu.pipeline_mode<synchronous>, transform_indices = @transform_1, window_bounds = array<i64: 1, 64>}, {pipeline_mode = #tpu.pipeline_mode<synchronous>, transform_indices = @transform_2, window_bounds = array<i64: 1, 64>}, {pipeline_mode = #tpu.pipeline_mode<synchronous>, transform_indices = @transform_3, window_bounds = array<i64: 288, 128>}, {pipeline_mode = #tpu.pipeline_mode<synchronous>, transform_indices = @transform_4, window_bounds = array<i64: 128, 8>}, {pipeline_mode = #tpu.pipeline_mode<synchronous>, transform_indices = @transform_5, window_bounds = array<i64: 8, 128>}, {transform_indices = @transform_6, window_bounds = array<i64: 1, 4, 128>}, {transform_indices = @transform_7, window_bounds = array<i64: 1, 2, 8>}]} {
    %c0 = arith.constant 0 : index
    %c0_0 = arith.constant 0 : index
    %c0_1 = arith.constant 0 : index
    %0 = vector.load %arg1[%c0, %c0_0, %c0_1] : memref<1x4x64xf32, #tpu.memory_space<vmem>>, vector<1x4x64xf32>
    %1 = vector.shape_cast %0 : vector<1x4x64xf32> to vector<4x64xf32>
    %c0_2 = arith.constant 0 : index
    %c0_3 = arith.constant 0 : index
    %2 = vector.load %arg2[%c0_2, %c0_3] : memref<1x64xf32, #tpu.memory_space<vmem>>, vector<1x64xf32>
    %3 = vector.broadcast %2 : vector<1x64xf32> to vector<4x64xf32>
    %4 = arith.mulf %1, %3 : vector<4x64xf32>
    %c0_4 = arith.constant 0 : index
    %c0_5 = arith.constant 0 : index
    %5 = vector.load %arg3[%c0_4, %c0_5] : memref<1x64xf32, #tpu.memory_space<vmem>>, vector<1x64xf32>
    %6 = vector.broadcast %5 : vector<1x64xf32> to vector<4x64xf32>
    %7 = arith.addf %4, %6 : vector<4x64xf32>
    %cst = arith.constant 0.000000e+00 : f32
    %8 = vector.broadcast %cst : f32 to vector<4x64xf32>
    %9 = arith.maximumf %7, %8 : vector<4x64xf32>
    %cst_6 = arith.constant 0.000000e+00 : f32
    %10 = vector.broadcast %cst_6 : f32 to vector<6x64xf32>
    %c0_7 = arith.constant 0 : index
    %c0_8 = arith.constant 0 : index
    %11 = vector.load %arg9[%c0_7, %c0_8] : memref<6x64xf32, #tpu.memory_space<vmem>>, vector<6x64xf32>
    tpu.vector_store %arg9[%c0_7, %c0_8], %10 {strides = array<i32>} : memref<6x64xf32, #tpu.memory_space<vmem>>, vector<6x64xf32>,
    %c1 = arith.constant 1 : index
    %c0_9 = arith.constant 0 : index
    %12 = vector.load %arg9[%c1, %c0_9] : memref<6x64xf32, #tpu.memory_space<vmem>>, vector<4x64xf32>
    tpu.vector_store %arg9[%c1, %c0_9], %9 {strides = array<i32>} : memref<6x64xf32, #tpu.memory_space<vmem>>, vector<4x64xf32>,
    %cst_10 = arith.constant 0.000000e+00 : f32
    %13 = vector.broadcast %cst_10 : f32 to vector<4x16xf32>
    %c0_11 = arith.constant 0 : index
    %c0_12 = arith.constant 0 : index
    %14 = vector.load %arg9[%c0_11, %c0_12] : memref<6x64xf32, #tpu.memory_space<vmem>>, vector<4x64xf32>
    %c1_13 = arith.constant 1 : index
    %c0_14 = arith.constant 0 : index
    %15 = vector.load %arg9[%c1_13, %c0_14] : memref<6x64xf32, #tpu.memory_space<vmem>>, vector<4x64xf32>
    %c2 = arith.constant 2 : index
    %c0_15 = arith.constant 0 : index
    %16 = vector.load %arg9[%c2, %c0_15] : memref<6x64xf32, #tpu.memory_space<vmem>>, vector<4x64xf32>
    %17 = tpu.concatenate %13, %14, %13, %13, %15, %13, %13, %16, %13 in 1 : vector<4x16xf32>, vector<4x64xf32>, vector<4x16xf32>, vector<4x16xf32>, vector<4x64xf32>, vector<4x16xf32>, vector<4x16xf32>, vector<4x64xf32>, vector<4x16xf32> -> vector<4x288xf32>
    %c0_16 = arith.constant 0 : index
    %c0_17 = arith.constant 0 : index
    %18 = vector.load %arg4[%c0_16, %c0_17] : memref<288x128xf32, #tpu.memory_space<vmem>>, vector<288x128xf32>
    %cst_18 = arith.constant dense<0.000000e+00> : vector<4x128xf32>
    %19 = tpu.matmul %17, %18, %cst_18 {dimension_numbers = #tpu.dot_dimension_numbers<[1], [0], [0], [1], [0, 0, 1, 1], [], []>} : vector<4x288xf32>, vector<288x128xf32>, vector<4x128xf32> -> vector<4x128xf32>
    %c0_19 = arith.constant 0 : index
    %c0_20 = arith.constant 0 : index
    %c0_21 = arith.constant 0 : index
    %20 = vector.load %arg7[%c0_19, %c0_20, %c0_21] : memref<1x4x128xf32, #tpu.memory_space<vmem>>, vector<1x4x128xf32>
    %21 = vector.shape_cast %20 : vector<1x4x128xf32> to vector<4x128xf32>
    %22 = vector.shape_cast %19 : vector<4x128xf32> to vector<1x4x128xf32>
    tpu.vector_store %arg7[%c0_19, %c0_20, %c0_21], %22 {strides = array<i32>} : memref<1x4x128xf32, #tpu.memory_space<vmem>>, vector<1x4x128xf32>,
    %cst_22 = arith.constant dense<0.000000e+00> : vector<128xf32>
    %23 = vector.multi_reduction <add>, %19, %cst_22 [0] : vector<4x128xf32> to vector<128xf32>
    %24 = vector.shape_cast %23 : vector<128xf32> to vector<1x128xf32>
    %c0_23 = arith.constant 0 : index
    %c0_24 = arith.constant 0 : index
    %25 = vector.load %arg5[%c0_23, %c0_24] : memref<128x8xf32, #tpu.memory_space<vmem>>, vector<128x8xf32>
    %cst_25 = arith.constant dense<0.000000e+00> : vector<1x8xf32>
    %26 = tpu.matmul %24, %25, %cst_25 {dimension_numbers = #tpu.dot_dimension_numbers<[1], [0], [0], [1], [0, 0, 1, 1], [], []>} : vector<1x128xf32>, vector<128x8xf32>, vector<1x8xf32> -> vector<1x8xf32>
    %cst_26 = arith.constant 1.562500e-02 : f32
    %27 = vector.broadcast %cst_26 : f32 to vector<1x8xf32>
    %28 = arith.mulf %26, %27 : vector<1x8xf32>
    %c0_27 = arith.constant 0 : index
    %c0_28 = arith.constant 0 : index
    %29 = vector.load %arg6[%c0_27, %c0_28] : memref<8x128xf32, #tpu.memory_space<vmem>>, vector<8x128xf32>
    %cst_29 = arith.constant dense<0.000000e+00> : vector<1x128xf32>
    %30 = tpu.matmul %28, %29, %cst_29 {dimension_numbers = #tpu.dot_dimension_numbers<[1], [0], [0], [1], [0, 0, 1, 1], [], []>} : vector<1x8xf32>, vector<8x128xf32>, vector<1x128xf32> -> vector<1x128xf32>
    %31 = vector.broadcast %30 : vector<1x128xf32> to vector<4x128xf32>
    %32 = arith.subf %19, %31 : vector<4x128xf32>
    %33 = arith.mulf %32, %32 : vector<4x128xf32>
    %cst_30 = arith.constant dense<0.000000e+00> : vector<128xf32>
    %34 = vector.multi_reduction <add>, %33, %cst_30 [0] : vector<4x128xf32> to vector<128xf32>
    %35 = vector.shape_cast %34 : vector<128xf32> to vector<1x128xf32>
    %c0_31 = arith.constant 0 : index
    %c0_32 = arith.constant 0 : index
    %36 = vector.load %arg5[%c0_31, %c0_32] : memref<128x8xf32, #tpu.memory_space<vmem>>, vector<128x8xf32>
    %cst_33 = arith.constant dense<0.000000e+00> : vector<1x8xf32>
    %37 = tpu.matmul %35, %36, %cst_33 {dimension_numbers = #tpu.dot_dimension_numbers<[1], [0], [0], [1], [0, 0, 1, 1], [], []>} : vector<1x128xf32>, vector<128x8xf32>, vector<1x8xf32> -> vector<1x8xf32>
    %38 = tpu.concatenate %26, %37 in 0 : vector<1x8xf32>, vector<1x8xf32> -> vector<2x8xf32>
    %c0_34 = arith.constant 0 : index
    %c0_35 = arith.constant 0 : index
    %c0_36 = arith.constant 0 : index
    %39 = vector.load %arg8[%c0_34, %c0_35, %c0_36] : memref<1x2x8xf32, #tpu.memory_space<vmem>>, vector<1x2x8xf32>
    %40 = vector.shape_cast %39 : vector<1x2x8xf32> to vector<2x8xf32>
    %41 = vector.shape_cast %38 : vector<2x8xf32> to vector<1x2x8xf32>
    tpu.vector_store %arg8[%c0_34, %c0_35, %c0_36], %41 {strides = array<i32>} : memref<1x2x8xf32, #tpu.memory_space<vmem>>, vector<1x2x8xf32>,
    return
  }
  func.func @transform_0(%arg0: i32) -> (i32, i32, i32) {
    %c0_i32 = arith.constant 0 : i32
    %c0_i32_0 = arith.constant 0 : i32
    %c0_i32_1 = arith.constant 0 : i32
    return %arg0, %c0_i32, %c0_i32_0 : i32, i32, i32
  }
  func.func @transform_1(%arg0: i32) -> (i32, i32) {
    %c0_i32 = arith.constant 0 : i32
    %c0_i32_0 = arith.constant 0 : i32
    %c0_i32_1 = arith.constant 0 : i32
    return %c0_i32, %c0_i32_0 : i32, i32
  }
  func.func @transform_2(%arg0: i32) -> (i32, i32) {
    %c0_i32 = arith.constant 0 : i32
    %c0_i32_0 = arith.constant 0 : i32
    %c0_i32_1 = arith.constant 0 : i32
    return %c0_i32, %c0_i32_0 : i32, i32
  }
  func.func @transform_3(%arg0: i32) -> (i32, i32) {
    %c0_i32 = arith.constant 0 : i32
    %c0_i32_0 = arith.constant 0 : i32
    %c0_i32_1 = arith.constant 0 : i32
    return %c0_i32, %c0_i32_0 : i32, i32
  }
  func.func @transform_4(%arg0: i32) -> (i32, i32) {
    %c0_i32 = arith.constant 0 : i32
    %c0_i32_0 = arith.constant 0 : i32
    %c0_i32_1 = arith.constant 0 : i32
    return %c0_i32, %c0_i32_0 : i32, i32
  }
  func.func @transform_5(%arg0: i32) -> (i32, i32) {
    %c0_i32 = arith.constant 0 : i32
    %c0_i32_0 = arith.constant 0 : i32
    %c0_i32_1 = arith.constant 0 : i32
    return %c0_i32, %c0_i32_0 : i32, i32
  }
  func.func @transform_6(%arg0: i32) -> (i32, i32, i32) {
    %c0_i32 = arith.constant 0 : i32
    %c0_i32_0 = arith.constant 0 : i32
    %c0_i32_1 = arith.constant 0 : i32
    return %arg0, %c0_i32, %c0_i32_0 : i32, i32, i32
  }
  func.func @transform_7(%arg0: i32) -> (i32, i32, i32) {
    %c0_i32 = arith.constant 0 : i32
    %c0_i32_0 = arith.constant 0 : i32
    %c0_i32_1 = arith.constant 0 : i32
    return %arg0, %c0_i32, %c0_i32_0 : i32, i32, i32
  }
}

module attributes {stable_mosaic.version = 11 : i64} {
  func.func @kernel(%arg0: i32, %arg1: memref<1x8x64xf32, #tpu.memory_space<vmem>>, %arg2: memref<1x64xf32, #tpu.memory_space<vmem>>, %arg3: memref<1x64xf32, #tpu.memory_space<vmem>>, %arg4: memref<240x32xf32, #tpu.memory_space<vmem>>, %arg5: memref<1x8x32xf32, #tpu.memory_space<vmem>>, %arg6: memref<10x64xf32, #tpu.memory_space<vmem>>) attributes {dimension_semantics = [#tpu.dimension_semantics<parallel>], iteration_bounds = array<i64: 2>, scalar_prefetch = 0 : i64, scratch_operands = 1 : i64, tpu.core_type = #tpu.core_type<tc>, window_params = [{transform_indices = @transform_0, window_bounds = array<i64: 1, 8, 64>}, {pipeline_mode = #tpu.pipeline_mode<synchronous>, transform_indices = @transform_1, window_bounds = array<i64: 1, 64>}, {pipeline_mode = #tpu.pipeline_mode<synchronous>, transform_indices = @transform_2, window_bounds = array<i64: 1, 64>}, {pipeline_mode = #tpu.pipeline_mode<synchronous>, transform_indices = @transform_3, window_bounds = array<i64: 240, 32>}, {transform_indices = @transform_4, window_bounds = array<i64: 1, 8, 32>}]} {
    %c0 = arith.constant 0 : index
    %c0_0 = arith.constant 0 : index
    %c0_1 = arith.constant 0 : index
    %0 = vector.load %arg1[%c0, %c0_0, %c0_1] : memref<1x8x64xf32, #tpu.memory_space<vmem>>, vector<1x8x64xf32>
    %1 = vector.shape_cast %0 : vector<1x8x64xf32> to vector<8x64xf32>
    %c0_2 = arith.constant 0 : index
    %c0_3 = arith.constant 0 : index
    %2 = vector.load %arg2[%c0_2, %c0_3] : memref<1x64xf32, #tpu.memory_space<vmem>>, vector<1x64xf32>
    %3 = vector.broadcast %2 : vector<1x64xf32> to vector<8x64xf32>
    %4 = arith.mulf %1, %3 : vector<8x64xf32>
    %c0_4 = arith.constant 0 : index
    %c0_5 = arith.constant 0 : index
    %5 = vector.load %arg3[%c0_4, %c0_5] : memref<1x64xf32, #tpu.memory_space<vmem>>, vector<1x64xf32>
    %6 = vector.broadcast %5 : vector<1x64xf32> to vector<8x64xf32>
    %7 = arith.addf %4, %6 : vector<8x64xf32>
    %cst = arith.constant 0.000000e+00 : f32
    %8 = vector.broadcast %cst : f32 to vector<8x64xf32>
    %9 = arith.maximumf %7, %8 : vector<8x64xf32>
    %cst_6 = arith.constant 0.000000e+00 : f32
    %10 = vector.broadcast %cst_6 : f32 to vector<10x64xf32>
    %c0_7 = arith.constant 0 : index
    %c0_8 = arith.constant 0 : index
    %11 = vector.load %arg6[%c0_7, %c0_8] : memref<10x64xf32, #tpu.memory_space<vmem>>, vector<10x64xf32>
    tpu.vector_store %arg6[%c0_7, %c0_8], %10 {strides = array<i32>} : memref<10x64xf32, #tpu.memory_space<vmem>>, vector<10x64xf32>,
    %c1 = arith.constant 1 : index
    %c0_9 = arith.constant 0 : index
    %12 = vector.load %arg6[%c1, %c0_9] : memref<10x64xf32, #tpu.memory_space<vmem>>, vector<8x64xf32>
    tpu.vector_store %arg6[%c1, %c0_9], %9 {strides = array<i32>} : memref<10x64xf32, #tpu.memory_space<vmem>>, vector<8x64xf32>,
    %cst_10 = arith.constant 0.000000e+00 : f32
    %13 = vector.broadcast %cst_10 : f32 to vector<8x8xf32>
    %c0_11 = arith.constant 0 : index
    %c0_12 = arith.constant 0 : index
    %14 = vector.load %arg6[%c0_11, %c0_12] : memref<10x64xf32, #tpu.memory_space<vmem>>, vector<8x64xf32>
    %c1_13 = arith.constant 1 : index
    %c0_14 = arith.constant 0 : index
    %15 = vector.load %arg6[%c1_13, %c0_14] : memref<10x64xf32, #tpu.memory_space<vmem>>, vector<8x64xf32>
    %c2 = arith.constant 2 : index
    %c0_15 = arith.constant 0 : index
    %16 = vector.load %arg6[%c2, %c0_15] : memref<10x64xf32, #tpu.memory_space<vmem>>, vector<8x64xf32>
    %17 = tpu.concatenate %13, %14, %13, %13, %15, %13, %13, %16, %13 in 1 : vector<8x8xf32>, vector<8x64xf32>, vector<8x8xf32>, vector<8x8xf32>, vector<8x64xf32>, vector<8x8xf32>, vector<8x8xf32>, vector<8x64xf32>, vector<8x8xf32> -> vector<8x240xf32>
    %c0_16 = arith.constant 0 : index
    %c0_17 = arith.constant 0 : index
    %18 = vector.load %arg4[%c0_16, %c0_17] : memref<240x32xf32, #tpu.memory_space<vmem>>, vector<240x32xf32>
    %cst_18 = arith.constant dense<0.000000e+00> : vector<8x32xf32>
    %19 = tpu.matmul %17, %18, %cst_18 {dimension_numbers = #tpu.dot_dimension_numbers<[1], [0], [0], [1], [0, 0, 1, 1], [], []>} : vector<8x240xf32>, vector<240x32xf32>, vector<8x32xf32> -> vector<8x32xf32>
    %20 = arith.negf %19 : vector<8x32xf32>
    %21 = math.exp %20 : vector<8x32xf32>
    %cst_19 = arith.constant 1.000000e+00 : f32
    %22 = vector.broadcast %cst_19 : f32 to vector<8x32xf32>
    %23 = arith.addf %22, %21 : vector<8x32xf32>
    %24 = arith.divf %22, %23 : vector<8x32xf32>
    %c0_20 = arith.constant 0 : index
    %c0_21 = arith.constant 0 : index
    %c0_22 = arith.constant 0 : index
    %25 = vector.load %arg5[%c0_20, %c0_21, %c0_22] : memref<1x8x32xf32, #tpu.memory_space<vmem>>, vector<1x8x32xf32>
    %26 = vector.shape_cast %25 : vector<1x8x32xf32> to vector<8x32xf32>
    %27 = vector.shape_cast %24 : vector<8x32xf32> to vector<1x8x32xf32>
    tpu.vector_store %arg5[%c0_20, %c0_21, %c0_22], %27 {strides = array<i32>} : memref<1x8x32xf32, #tpu.memory_space<vmem>>, vector<1x8x32xf32>,
    return
  }
  func.func @transform_0(%arg0: i32) -> (i32, i32, i32) {
    %c0_i32 = arith.constant 0 : i32
    %c0_i32_0 = arith.constant 0 : i32
    %c0_i32_1 = arith.constant 0 : i32
    return %arg0, %c0_i32, %c0_i32_0 : i32, i32, i32
  }
  func.func @transform_1(%arg0: i32) -> (i32, i32) {
    %c0_i32 = arith.constant 0 : i32
    %c0_i32_0 = arith.constant 0 : i32
    %c0_i32_1 = arith.constant 0 : i32
    return %c0_i32, %c0_i32_0 : i32, i32
  }
  func.func @transform_2(%arg0: i32) -> (i32, i32) {
    %c0_i32 = arith.constant 0 : i32
    %c0_i32_0 = arith.constant 0 : i32
    %c0_i32_1 = arith.constant 0 : i32
    return %c0_i32, %c0_i32_0 : i32, i32
  }
  func.func @transform_3(%arg0: i32) -> (i32, i32) {
    %c0_i32 = arith.constant 0 : i32
    %c0_i32_0 = arith.constant 0 : i32
    %c0_i32_1 = arith.constant 0 : i32
    return %c0_i32, %c0_i32_0 : i32, i32
  }
  func.func @transform_4(%arg0: i32) -> (i32, i32, i32) {
    %c0_i32 = arith.constant 0 : i32
    %c0_i32_0 = arith.constant 0 : i32
    %c0_i32_1 = arith.constant 0 : i32
    return %arg0, %c0_i32, %c0_i32_0 : i32, i32, i32
  }
}

</mosaic_0001>

<bundles_post_ra>
// kernel: tile.22
= control target key start
LH: loop header
LB: loop body
LE: loop exit
PB: predicated region body
PF: predicated region fallthrough
CT: control target
= control target key end

     0   :  { %s20_s0 = inlined_call_operand.<no memory space> [shape: f32[], index: 0, kind: input, shape index: {}]   ;;  %s21_s1 = inlined_call_operand.vmem [shape: f32[1,64], index: 1, kind: output, shape index: {}]  }
   0x1   :  { %v2_v0 = vstv %s20_s0 }
   0x2   :  { %3 = vst [vmem:[%s21_s1] sm:$0x1] %v2_v0 }

// kernel: tile.32
= control target key start
LH: loop header
LB: loop body
LE: loop exit
PB: predicated region body
PF: predicated region fallthrough
CT: control target
= control target key end

     0   :  { %s22_s0 = inlined_call_operand.vmem [shape: f32[16], index: 0, kind: input, shape index: {}]   ;;  %s23_s1 = inlined_call_operand.vmem [shape: f32[4,16], index: 1, kind: output, shape index: {}]  }
   0x1   :  { %v4_v0 = vld [vmem:[%s22_s0] ss:$0 sm:$0xff] }
   0x2   :  { %5 = vst [vmem:[%s23_s1] sm:$0xf] %v4_v0 }

// kernel: tile.33
= control target key start
LH: loop header
LB: loop body
LE: loop exit
PB: predicated region body
PF: predicated region fallthrough
CT: control target
= control target key end

     0   :  { %vm8_vm0 = vcmask 130048   ;;  %s40_s8 = smov 16   ;;  %s41_s9 = smov 32   ;;  %vm14_vm1 = vcmask 523648   ;;  %vm20_vm2 = vcmask 392448   ;;  %vm26_vm3 = vcmask 261248   ;;  %s58_s0 = inlined_call_operand.vmem [shape: f32[4,16], index: 0, kind: input, shape index: {}]   ;;  %s59_s1 = inlined_call_operand.vmem [shape: f32[1,64], index: 1, kind: output, shape index: {}]  }
   0x1   :  { %v5_v0 = vld [vmem:[%s58_s0] sm:$0xf]  ;;  %s39_s0 = smov 48  }
   0x2   :  { %6 = vst [vmem:[#allocation1] sm:$0xf] %v5_v0 }
   0x9   :  { %v11_v1 = vld [vmem:[#allocation1 + $0x3] sm:$0x1]   ;;  %v23_v2 = vld [vmem:[#allocation1 + $0x1] sm:$0x1]   ;;  %v7_v3 = vld [vmem:[#allocation1] sm:$0x1]  }
   0xa   :  { %12 = vrot.lane.b32.xlu0 %v11_v1, %s39_s0  ;;  %24 = vrot.lane.b32.xlu1 %v23_v2, %s40_s8  ;;  %v17_v4 = vld [vmem:[#allocation1 + $0x2] sm:$0x1]   ;;  %9 = vst.msk [vmem:[#allocation0] sm:$0x1] %vm8_vm0, %v7_v3  }
   0xe   :  { %18 = vrot.lane.b32.xlu0 %v17_v4, %s41_s9 }
  0x7c   :  { %v13_v5 = vpop.permute.xlu0 %12   ;;  %v25_v6 = vpop.permute.xlu1 %24  }
  0x7d   :  { %15 = vst.msk [vmem:[#allocation0] sm:$0x1] %vm14_vm1, %v13_v5  }
  0x80   :  { %v19_v7 = vpop.permute.xlu0 %18  }
  0x81   :  { %21 = vst.msk [vmem:[#allocation0] sm:$0x1] %vm20_vm2, %v19_v7  }
  0x82   :  { %27 = vst.msk [vmem:[#allocation0] sm:$0x1] %vm26_vm3, %v25_v6  }
  0x89   :  { %v32_v8 = vld [vmem:[#allocation0] sm:$0x1] }
  0x8a   :  { %35 = vst [vmem:[%s59_s1] sm:$0x1] %v32_v8 }

// kernel: tile.42
= control target key start
LH: loop header
LB: loop body
LE: loop exit
PB: predicated region body
PF: predicated region fallthrough
CT: control target
= control target key end

     0   :  { %s22_s0 = inlined_call_operand.vmem [shape: f32[8], index: 0, kind: input, shape index: {}]   ;;  %s23_s1 = inlined_call_operand.vmem [shape: f32[8,8], index: 1, kind: output, shape index: {}]  }
   0x1   :  { %v4_v0 = vld [vmem:[%s22_s0] ss:$0 sm:$0xff] }
   0x2   :  { %5 = vst [vmem:[%s23_s1] sm:$0xff] %v4_v0 }

// kernel: tile.43
= control target key start
LH: loop header
LB: loop body
LE: loop exit
PB: predicated region body
PF: predicated region fallthrough
CT: control target
= control target key end

     0   :  { %s69_s10 = smov 56   ;;  %s70_s11 = smov 40   ;;  %vm3_vm0 = vcmask 64512   ;;  %vm9_vm1 = vcmask 523712   ;;  %vm15_vm2 = vcmask 458112   ;;  %vm21_vm3 = vcmask 392512   ;;  %s113_s0 = inlined_call_operand.vmem [shape: f32[8,8], index: 0, kind: input, shape index: {}]   ;;  %s114_s1 = inlined_call_operand.vmem [shape: f32[1,64], index: 1, kind: output, shape index: {}]  }
   0x1   :  { %v55_v0 = vld [vmem:[%s113_s0 + $0x7] sm:$0x1]   ;;  %v57_v1 = vld [vmem:[%s113_s0 + $0x5] sm:$0x1]   ;;  %v56_v2 = vld [vmem:[%s113_s0 + $0x6] sm:$0x1]  }
   0x2   :  { %7 = vrot.lane.b32.xlu0 %v55_v0, %s69_s10  ;;  %19 = vrot.lane.b32.xlu1 %v57_v1, %s70_s11  ;;  %v58_v3 = vld [vmem:[%s113_s0 + $0x4] sm:$0x1]   ;;  %v2_v4 = vld [vmem:[%s113_s0] sm:$0x1]   ;;  %s71_s18 = smov 48   ;;  %s72_s19 = smov 32  }
   0x3   :  { %4 = vst.msk [vmem:[#allocation0] sm:$0x1] %vm3_vm0, %v2_v4   ;;  %v59_v5 = vld [vmem:[%s113_s0 + $0x3] sm:$0x1]   ;;  %v60_v6 = vld [vmem:[%s113_s0 + $0x2] sm:$0x1]  }
   0x4   :  { %s73_s24 = smov 24   ;;  %s74_s25 = smov 16   ;;  %v61_v7 = vld [vmem:[%s113_s0 + $0x1] sm:$0x1]   ;;  %vm27_vm4 = vcmask 326912   ;;  %vm33_vm5 = vcmask 261312  }
   0x5   :  { %s75_s0 = smov 8   ;;  %vm39_vm6 = vcmask 195712   ;;  %vm45_vm7 = vcmask 130112  }
   0x6   :  { %13 = vrot.lane.b32.xlu0 %v56_v2, %s71_s18  ;;  %25 = vrot.lane.b32.xlu1 %v58_v3, %s72_s19 }
   0xa   :  { %31 = vrot.lane.b32.xlu0 %v59_v5, %s73_s24  ;;  %37 = vrot.lane.b32.xlu1 %v60_v6, %s74_s25 }
   0xe   :  { %43 = vrot.lane.b32.xlu0 %v61_v7, %s75_s0 }
  0x74   :  { %v8_v8 = vpop.permute.xlu0 %7   ;;  %v20_v9 = vpop.permute.xlu1 %19  }
  0x75   :  { %10 = vst.msk [vmem:[#allocation0] sm:$0x1] %vm9_vm1, %v8_v8  }
  0x78   :  { %v14_v10 = vpop.permute.xlu0 %13   ;;  %v26_v11 = vpop.permute.xlu1 %25  }
  0x79   :  { %16 = vst.msk [vmem:[#allocation0] sm:$0x1] %vm15_vm2, %v14_v10  }
  0x7a   :  { %22 = vst.msk [vmem:[#allocation0] sm:$0x1] %vm21_vm3, %v20_v9  }
  0x7b   :  { %28 = vst.msk [vmem:[#allocation0] sm:$0x1] %vm27_vm4, %v26_v11  }
  0x7c   :  { %v32_v12 = vpop.permute.xlu0 %31   ;;  %v38_v13 = vpop.permute.xlu1 %37  }
  0x7d   :  { %34 = vst.msk [vmem:[#allocation0] sm:$0x1] %vm33_vm5, %v32_v12  }
  0x7e   :  { %40 = vst.msk [vmem:[#allocation0] sm:$0x1] %vm39_vm6, %v38_v13  }
  0x80   :  { %v44_v14 = vpop.permute.xlu0 %43  }
  0x81   :  { %46 = vst.msk [vmem:[#allocation0] sm:$0x1] %vm45_vm7, %v44_v14  }
  0x88   :  { %v51_v15 = vld [vmem:[#allocation0] sm:$0x1] }
  0x89   :  { %54 = vst [vmem:[%s114_s1] sm:$0x1] %v51_v15 }

// kernel: vae_decoder_forward.4
= control target key start
LH: loop header
LB: loop body
LE: loop exit
PB: predicated region body
PF: predicated region fallthrough
CT: control target
= control target key end

     0   :  { %10 = vsyncpa [#allocation3], 0  ;;  %s354_s0 = inlined_call_operand.vmem [shape: f32[2,8], index: 0, kind: input, shape index: {}]   ;;  %s355_s1 = inlined_call_operand.hbm [shape: f32[8,32], index: 1, kind: input, shape index: {}]   ;;  %s356_s2 = inlined_call_operand.vmem [shape: f32[1,32], index: 2, kind: input, shape index: {}]   ;;  %s357_s3 = inlined_call_operand.hbm [shape: f32[32,128], index: 3, kind: input, shape index: {}]   ;;  %s358_s4 = inlined_call_operand.vmem [shape: f32[1,128], index: 4, kind: input, shape index: {}]   ;;  %s359_s5 = inlined_call_operand.vmem [shape: f32[2,128], index: 5, kind: output, shape index: {}]  }
   0x1   :  { %11 = vsyncpa [#allocation5], 0  ;;  %s300_s18 = smov [#allocation2]   ;;  %s301_s20 = smov [#allocation4]  }
   0x2   :  { %s20_s19 = sshll.u32 %s300_s18, 4  ;;  %s31_s21 = sshll.u32 %s301_s20, 4  ;;  %s21_s19 = int_to_ptr.vmem [resolvable:$true] %s20_s19  ;;  %s32_s21 = int_to_ptr.vmem [resolvable:$true] %s31_s21 }
   0x3   :  { %s264_s22 = scalar_lea.vmem %s21_s19, 128  ;;  %p269_p1 = scmp.lt.s32.totalorder %s21_s19, %s21_s19 }
   0x4   :  { %p265_p0 = scmp.ne.s32.totalorder %s21_s19, %s264_s22  ;;  %p270_p2 = scmp.lt.s32.totalorder %s264_s22, %s264_s22 }
   0x6   :  { %p271_p3 = por %p270_p2, %p269_p1 }
   0x8   :  { %p272_p4 = pnand %p271_p3, %p265_p0 }
   0xa   :  { %275 = shalt.err (!%p272_p4)
}
   0xb   :  { %23 = dma.hbm_to_vmem [thread:$0]  %s355_s1, 128, %s21_s19, [#allocation3]  }
   0xc   :  { %s284_s25 = scalar_lea.vmem %s32_s21, 512  ;;  %p289_p6 = scmp.lt.s32.totalorder %s32_s21, %s32_s21 }
   0xd   :  { %p285_p5 = scmp.ne.s32.totalorder %s32_s21, %s284_s25  ;;  %p290_p7 = scmp.lt.s32.totalorder %s284_s25, %s284_s25 }
   0xf   :  { %p291_p8 = por %p290_p7, %p289_p6 }
  0x11   :  { %p292_p9 = pnand %p291_p8, %p285_p5 }
  0x13   :  { %295 = shalt.err (!%p292_p9)
}
  0x14   :  { %s302_s26 = smov 128   ;;  %s303_s27 = smov 8  }
  0x15   :  { %37 = dma.hbm_to_vmem [thread:$0]  %s357_s3, 512, %s32_s21, [#allocation5], %s302_s26, %s302_s26, %s303_s27  }
  0x16   :  { %296 = dma.done.wait [#allocation3], 128  }
  0x17   :  { %297 = vsyncadd [#allocation3], 4294967168 }
  0x18   :  { %298 = dma.done.wait [#allocation5], 512  }
  0x19   :  { %299 = vsyncadd [#allocation5], 4294966784  ;;  %v304_v0 = vmov 0.0   ;;  %vm305_vm0 = vmmov 0   ;;  %vm55_vm1 = vcmask 64512   ;;  %v47_v1 = vld [vmem:[#allocation2] sm:$0xff] }
  0x1a   :  { %234 = vmatprep.subr.mxu0 %v304_v0  ;;  %236 = vmatprep.mubr.msk.f32.mxu0 %vm305_vm0, %v304_v0  ;;  %v46_v2 = vld [vmem:[%s354_s0] sm:$0x3]  ;;  %v132_v4 = vld [vmem:[#allocation4 + $0x10] sm:$0xff]  ;;  %v131_v5 = vld [vmem:[#allocation4 + $0x8] sm:$0xff]  ;;  %vm141_vm2 = vcmask 261120  }
  0x1b   :  { %239 = vmatprep.subr.mxu1 %v304_v0  ;;  %247 = vmatprep.mubr.msk.f32.mxu1 %vm305_vm0, %v304_v0  ;;  %v133_v3 = vld [vmem:[#allocation4 + $0x18] sm:$0xff]  ;;  %v130_v6 = vld [vmem:[#allocation4] sm:$0xff] }
  0x1c   :  { %235 = vmatpush3.msra.mxu0 %v47_v1  ;;  %240 = vmatpush3.msra.mxu1 %v133_v3  ;;  %v223_v7 = vld [vmem:[%s356_s2] ss:$0 sm:$0xff] }
  0x1d   :  { %237 = vmatmul.mubr.msk.f32.vlgmr.msra.gmra.mxu0 %vm55_vm1, %v46_v2  ;;  %241 = vmatprep.subr.mxu1 %v304_v0  ;;  %v225_v12 = vld [vmem:[%s358_s4] ss:$0 sm:$0xff] }
  0x1e   :  { %242 = vmatpush3.msra.mxu1 %v132_v4 }
  0x1f   :  { %243 = vmatprep.subr.mxu1 %v304_v0 }
  0x20   :  { %244 = vmatpush3.msra.mxu1 %v131_v5 }
  0x21   :  { %245 = vmatprep.subr.mxu1 %v304_v0 }
  0x22   :  { %246 = vmatpush3.msra.mxu1 %v130_v6 }
  0xdd   :  { %v125_v8 = vpop.f32.mrf.mxu0 }
  0xde   :  { %v126_v9 = vadd.f32 %v223_v7, %v125_v8 }
  0xdf   :  { %v238_v10 = vpop.f32.mrf.mxu0 }
  0xe0   :  { %v129_v11 = vmax.f32 %v126_v9, 0.0 }
  0xe2   :  { %248 = vmatmul.mubr.msk.f32.vlgmr.msra.gmra.mxu1 %vm141_vm2, %v129_v11 }
 0x1a2   :  { %v211_v13 = vpop.f32.mrf.mxu1 }
 0x1a3   :  { %v212_v14 = vadd.f32 %v225_v12, %v211_v13 }
 0x1a4   :  { %v249_v15 = vpop.f32.mrf.mxu1 }
 0x1a5   :  { %v215_v16 = vmax.f32 %v212_v14, 0.0 }
 0x1a7   :  { %216 = vst [vmem:[%s359_s5] sm:$0x3] %v215_v16 }
 0x1a8   :  { %221 = vsyncpa [#allocation3], 1 }
 0x1a9   :  { %222 = vsyncpa [#allocation5], 1 }

// kernel: vae_decoder_forward.6
= control target key start
LH: loop header
LB: loop body
LE: loop exit
PB: predicated region body
PF: predicated region fallthrough
CT: control target
= control target key end

     0   :  { %s1103_s24 = smov 0   ;;  %s1346_s0 = inlined_call_operand.vmem [shape: f32[2,4,64], index: 0, kind: input, shape index: {}]   ;;  %s1347_s1 = inlined_call_operand.vmem [shape: f32[1,64], index: 1, kind: input, shape index: {}]   ;;  %s1348_s2 = inlined_call_operand.vmem [shape: f32[1,64], index: 2, kind: input, shape index: {}]   ;;  %s1349_s3 = inlined_call_operand.vmem [shape: f32[288,128], index: 3, kind: input, shape index: {}]   ;;  %s1350_s4 = inlined_call_operand.vmem [shape: f32[128,8], index: 4, kind: input, shape index: {}]   ;;  %s1351_s5 = inlined_call_operand.vmem [shape: f32[8,128], index: 5, kind: input, shape index: {}]   ;;  %s1352_s6 = inlined_call_operand.vmem [shape: f32[2,4,128], index: 6, kind: output, shape index: {0}]   ;;  %s1353_s7 = inlined_call_operand.vmem [shape: f32[2,2,8], index: 7, kind: output, shape index: {1}]  }
   0x1 LB: > { %s861_s25 = sadd.s32 4294967295, %s1056_s24   ;;  %p865_p0 = scmp.ge.s32.totalorder %s1056_s24, 1  ;;  %s1056_s24 = sphi %s1103_s24, %s18_s24  }
   0x2   : > { %p239_p1 = scmp.lt.s32.totalorder %s1056_s24, 3 }
   0x4   : > { %p240_p2 = pnand %p865_p0, %p239_p1 }
   0x5   : > { %p273_p3 = scmp.lt.s32.totalorder (!%p240_p2), %s861_s25, 1  ;;  %s1060_s21 = smov (!%p240_p2), 16  }
   0x6   : > { %243 = sbr.rel (%p240_p2) target bundleno = 969 (0x3c9), region = 44  ;;  %s1061_s22 = smov (!%p240_p2), 80  }
   0x7   : > { %s1062_s10 = smov (!%p240_p2), 112  }
   0xb   : > { %vm303_vm0 = vcmask 521216   ;;  %v367_v0 = vld [vmem:[%s1349_s3 + $0xf8] sm:$0xff]  ;;  %s1355_s25 = smov (!%p273_p3, %s861_s25), 1  ;;  %v1058_v2 = vmov 0.0   ;;  %v366_v3 = vld [vmem:[%s1349_s3 + $0xf0] sm:$0xff]  ;;  %v365_v5 = vld [vmem:[%s1349_s3 + $0xe8] sm:$0xff] }
   0xc   : > { %v351_v1 = vld [vmem:[%s1349_s3 + $0x78] sm:$0xff]  ;;  %304 = vst.msk [vmem:[#allocation2] sm:$0x3f] %vm303_vm0, %v1058_v2  ;;  %875 = vmatprep.subr.mxu0 %v367_v0  ;;  %v350_v4 = vld [vmem:[%s1349_s3 + $0x70] sm:$0xff]  ;;  %951 = vmatprep.subr.mxu1 %v1058_v2  ;;  %s866_s13 = sshll.u32 %s1355_s25, 2  ;;  %v349_v7 = vld [vmem:[%s1349_s3 + $0x68] sm:$0xff] }
   0xd   : > { %876 = vmatpush3.msra.mxu0 %v351_v1  ;;  %v869_v6 = vld [vmem:[%s1347_s1] ss:$0 sm:$0xff]  ;;  %s276_s20 = scalar_lea.vmem %s1346_s0, %s866_s13  ;;  %v363_v13 = vld [vmem:[%s1349_s3 + $0xd8] sm:$0xff]  ;;  %v362_v16 = vld [vmem:[%s1349_s3 + $0xd0] sm:$0xff]  ;;  %vm305_vm1 = vcmask 519168   ;;  %vm1059_vm2 = vmmov 0  }
   0xe   : > { %877 = vmatprep.subr.mxu0 %v366_v3  ;;  %v364_v8 = vld [vmem:[%s1349_s3 + $0xe0] sm:$0xff]  ;;  %v347_v14 = vld [vmem:[%s1349_s3 + $0x58] sm:$0xff]  ;;  %v346_v18 = vld [vmem:[%s1349_s3 + $0x50] sm:$0xff]  ;;  %959 = vmatprep.mubr.msk.f32.mxu1 %vm1059_vm2, %v1058_v2  ;;  %vm322_vm3 = vcmask 130048   ;;  %vm324_vm4 = vcmask 654336   ;;  %vm372_vm5 = vcmask 261120  }
   0xf   : > { %878 = vmatpush3.msra.mxu0 %v350_v4  ;;  %v285_v9 = vld [vmem:[%s276_s20] sm:$0xf]  ;;  %v371_v17 = vld [vmem:[%s1349_s3 + $0x118] sm:$0xff]  ;;  %v370_v19 = vld [vmem:[%s1349_s3 + $0x110] sm:$0xff]  ;;  %vm326_vm6 = vcmask 785408   ;;  %vm330_vm7 = vcmask 392192   ;;  %s280_s20 = scalar_lea.vmem %s1352_s6, %s866_s13 }
  0x10   : > { %v870_v10 = vld [vmem:[%s1348_s2] ss:$0 sm:$0xff]  ;;  %879 = vmatprep.subr.mxu0 %v365_v5  ;;  %v293_v12 = vmul.f32 %v869_v6, %v285_v9  ;;  %952 = vmatpush3.msra.mxu1 %v371_v17  ;;  %v361_v21 = vld [vmem:[%s1349_s3 + $0xc8] sm:$0xff]  ;;  %v359_v27 = vld [vmem:[%s1349_s3 + $0xb8] sm:$0xff]  ;;  %vm332_vm8 = vcmask 523264   ;;  %vm328_vm9 = vcmask 916480  }
  0x11   : > { %v348_v11 = vld [vmem:[%s1349_s3 + $0x60] sm:$0xff]  ;;  %880 = vmatpush3.msra.mxu0 %v349_v7  ;;  %953 = vmatprep.subr.mxu1 %v1058_v2  ;;  %v369_v22 = vld [vmem:[%s1349_s3 + $0x108] sm:$0xff]  ;;  %v343_v28 = vld [vmem:[%s1349_s3 + $0x38] sm:$0xff]  ;;  %vm517_vm10 = vcmask 1043456   ;;  %vm613_vm11 = vcmask 64512   ;;  %s868_s13 = sshll.u32 %s1355_s25, 1 }
  0x12   : > { %881 = vmatprep.subr.mxu0 %v364_v8  ;;  %v301_v15 = vadd.f32 %v870_v10, %v293_v12  ;;  %v345_v23 = vld [vmem:[%s1349_s3 + $0x48] sm:$0xff]  ;;  %954 = vmatpush3.msra.mxu1 %v370_v19  ;;  %v360_v24 = vld [vmem:[%s1349_s3 + $0xc0] sm:$0xff]  ;;  %v358_v29 = vld [vmem:[%s1349_s3 + $0xb0] sm:$0xff]  ;;  %vm773_vm12 = vcmask 1040384   ;;  %s284_s27 = scalar_lea.vmem %s1353_s7, %s868_s13  ;;  %vm775_vm13 = vcmask 58368  }
  0x13   : > { %882 = vmatpush3.msra.mxu0 %v348_v11  ;;  %955 = vmatprep.subr.mxu1 %v1058_v2  ;;  %v368_v25 = vld [vmem:[%s1349_s3 + $0x100] sm:$0xff]  ;;  %v342_v30 = vld [vmem:[%s1349_s3 + $0x30] sm:$0xff]  ;;  %v357_v33 = vld [vmem:[%s1349_s3 + $0xa8] sm:$0xff] }
  0x14   : > { %883 = vmatprep.subr.mxu0 %v363_v13  ;;  %v302_v20 = vmax.f32 %v301_v15, 0.0  ;;  %v344_v26 = vld [vmem:[%s1349_s3 + $0x40] sm:$0xff]  ;;  %956 = vmatpush3.msra.mxu1 %v369_v22  ;;  %v341_v34 = vld [vmem:[%s1349_s3 + $0x28] sm:$0xff]  ;;  %v355_v38 = vld [vmem:[%s1349_s3 + $0x98] sm:$0xff] }
  0x15   : > { %884 = vmatpush3.msra.mxu0 %v347_v14  ;;  %957 = vmatprep.subr.mxu1 %v1058_v2  ;;  %v356_v36 = vld [vmem:[%s1349_s3 + $0xa0] sm:$0xff]  ;;  %v339_v39 = vld [vmem:[%s1349_s3 + $0x18] sm:$0xff]  ;;  %v354_v40 = vld [vmem:[%s1349_s3 + $0x90] sm:$0xff] }
  0x16   : > { %885 = vmatprep.subr.mxu0 %v362_v16  ;;  %306 = vst.msk [vmem:[#allocation2 + $0x1] sm:$0xf] %vm305_vm1, %v302_v20  ;;  %958 = vmatpush3.msra.mxu1 %v368_v25  ;;  %v340_v37 = vld [vmem:[%s1349_s3 + $0x20] sm:$0xff]  ;;  %v338_v41 = vld [vmem:[%s1349_s3 + $0x10] sm:$0xff]  ;;  %v353_v42 = vld [vmem:[%s1349_s3 + $0x88] sm:$0xff] }
  0x17   : > { %886 = vmatpush3.msra.mxu0 %v346_v18  ;;  %962 = vmatprep.subr.mxu1 %v1058_v2  ;;  %v337_v43 = vld [vmem:[%s1349_s3 + $0x8] sm:$0xff]  ;;  %v352_v44 = vld [vmem:[%s1349_s3 + $0x80] sm:$0xff]  ;;  %v540_v48 = vld [vmem:[%s1350_s4 + $0x78] sm:$0xff] }
  0x18   : > { %887 = vmatprep.subr.mxu0 %v361_v21  ;;  %v336_v45 = vld [vmem:[%s1349_s3] sm:$0xff]  ;;  %v539_v52 = vld [vmem:[%s1350_s4 + $0x70] sm:$0xff]  ;;  %v538_v54 = vld [vmem:[%s1350_s4 + $0x68] sm:$0xff] }
  0x19   : > { %888 = vmatpush3.msra.mxu0 %v345_v23  ;;  %v537_v58 = vld [vmem:[%s1350_s4 + $0x60] sm:$0xff]  ;;  %v536_v61 = vld [vmem:[%s1350_s4 + $0x58] sm:$0xff]  ;;  %v535_v62 = vld [vmem:[%s1350_s4 + $0x50] sm:$0xff] }
  0x1a   : > { %889 = vmatprep.subr.mxu0 %v360_v24  ;;  %v534_v63 = vld [vmem:[%s1350_s4 + $0x48] sm:$0xff]  ;;  %v533_v0 = vld [vmem:[%s1350_s4 + $0x40] sm:$0xff]  ;;  %v532_v1 = vld [vmem:[%s1350_s4 + $0x38] sm:$0xff] }
  0x1b   : > { %890 = vmatpush3.msra.mxu0 %v344_v26  ;;  %v531_v3 = vld [vmem:[%s1350_s4 + $0x30] sm:$0xff]  ;;  %v530_v4 = vld [vmem:[%s1350_s4 + $0x28] sm:$0xff]  ;;  %v529_v5 = vld [vmem:[%s1350_s4 + $0x20] sm:$0xff] }
  0x1c   : > { %891 = vmatprep.subr.mxu0 %v359_v27  ;;  %v528_v6 = vld [vmem:[%s1350_s4 + $0x18] sm:$0xff]  ;;  %v527_v7 = vld [vmem:[%s1350_s4 + $0x10] sm:$0xff]  ;;  %v526_v8 = vld [vmem:[%s1350_s4 + $0x8] sm:$0xff]  ;;  %v687_v27 = vlaneseq }
  0x1d   : > { %892 = vmatpush3.msra.mxu0 %v343_v28  ;;  %v307_v31 = vld [vmem:[#allocation2] sm:$0xf] }
  0x1e   : > { %v309_v32 = vld [vmem:[#allocation2 + $0x2] sm:$0xf]  ;;  %893 = vmatprep.subr.mxu0 %v358_v29  ;;  %311 = vrot.lane.b32.xlu0 %v307_v31, %s1060_s21  ;;  %v688_v28 = vshrl.u32 %v687_v27, 7 }
  0x1f   : > { %319 = vrot.lane.b32.xlu1 %v309_v32, %s1061_s22  ;;  %v308_v35 = vld [vmem:[#allocation2 + $0x1] sm:$0xf]  ;;  %894 = vmatpush3.msra.mxu0 %v342_v30 }
  0x20   : > { %895 = vmatprep.subr.mxu0 %v357_v33  ;;  %v525_v9 = vld [vmem:[%s1350_s4] sm:$0xff]  ;;  %v689_v29 = vsub.s32 0, %v688_v28 }
  0x21   : > { %896 = vmatpush3.msra.mxu0 %v341_v34  ;;  %v612_v23 = vld [vmem:[%s1351_s5] sm:$0xff] }
  0x22   : > { %315 = vrot.lane.b32.xlu0 %v308_v35, %s1062_s10  ;;  %897 = vmatprep.subr.mxu0 %v356_v36 }
  0x23   : > { %898 = vmatpush3.msra.mxu0 %v340_v37 }
  0x24   : > { %899 = vmatprep.subr.mxu0 %v355_v38 }
  0x25   : > { %900 = vmatpush3.msra.mxu0 %v339_v39 }
  0x26   : > { %901 = vmatprep.subr.mxu0 %v354_v40 }
  0x27   : > { %902 = vmatpush3.msra.mxu0 %v338_v41 }
  0x28   : > { %903 = vmatprep.subr.mxu0 %v353_v42 }
  0x29   : > { %904 = vmatpush3.msra.mxu0 %v337_v43 }
  0x2a   : > { %905 = vmatprep.subr.mxu0 %v352_v44 }
  0x2b   : > { %906 = vmatpush3.msra.mxu0 %v336_v45 }
  0x2c   : > { %1002 = vmatprep.subr.mxu0 %v1058_v2 }
  0x90   : > { %v312_v46 = vpop.permute.xlu0 %311 }
  0x91   : > { %v320_v47 = vpop.permute.xlu1 %319  ;;  %v323_v49 = vsel %vm322_vm3, 0.0, %v312_v46 }
  0x92   : > { %v335_v50 = vsel %vm322_vm3, %v320_v47, 0.0  ;;  %v325_v51 = vsel %vm324_vm4, %v323_v49, 0.0 }
  0x93   : > { %960 = vmatmul.mubr.msk.f32.vlgmr.msra.gmra.mxu1 %vm372_vm5, %v335_v50  ;;  %v327_v55 = vsel %vm326_vm6, %v325_v51, 0.0 }
  0x94   : > { %963 = vmatpush3.msra.mxu1 %v540_v48  ;;  %994 = vmatprep.mubr.msk.f32.mxu1 %vm1059_vm2, %v1058_v2  ;;  %v316_v53 = vpop.permute.xlu0 %315 }
  0x95   : > { %964 = vmatprep.subr.mxu1 %v1058_v2  ;;  %v331_v56 = vsel %vm330_vm7, %v316_v53, 0.0  ;;  %v329_v60 = vsel %vm328_vm9, %v327_v55, %v316_v53 }
  0x96   : > { %965 = vmatpush3.msra.mxu1 %v539_v52  ;;  %v333_v57 = vsel %vm332_vm8, %v331_v56, 0.0 }
  0x97   : > { %966 = vmatprep.subr.mxu1 %v1058_v2  ;;  %v334_v59 = vsel %vm324_vm4, %v333_v57, %v320_v47 }
  0x98   : > { %967 = vmatpush3.msra.mxu1 %v538_v54  ;;  %440 = vmatprep.mubr.f32.mxu0 %v334_v59 }
  0x99   : > { %968 = vmatprep.subr.mxu1 %v1058_v2  ;;  %441 = vmatmul.mubr.f32.vlgmr.msra.gmra.mxu0 %v329_v60 }
  0x9a   : > { %969 = vmatpush3.msra.mxu1 %v537_v58  ;;  %1003 = vmatpush3.msra.mxu0 %v540_v48 }
  0x9b   : > { %970 = vmatprep.subr.mxu1 %v1058_v2  ;;  %1004 = vmatprep.subr.mxu0 %v1058_v2 }
  0x9c   : > { %1034 = vmatprep.mubr.msk.f32.mxu0 %vm1059_vm2, %v1058_v2  ;;  %1005 = vmatpush3.msra.mxu0 %v539_v52 }
  0x9d   : > { %1006 = vmatprep.subr.mxu0 %v1058_v2  ;;  %971 = vmatpush3.msra.mxu1 %v536_v61 }
  0x9e   : > { %1007 = vmatpush3.msra.mxu0 %v538_v54  ;;  %972 = vmatprep.subr.mxu1 %v1058_v2 }
  0x9f   : > { %1008 = vmatprep.subr.mxu0 %v1058_v2  ;;  %973 = vmatpush3.msra.mxu1 %v535_v62 }
  0xa0   : > { %1009 = vmatpush3.msra.mxu0 %v537_v58  ;;  %974 = vmatprep.subr.mxu1 %v1058_v2 }
  0xa1   : > { %1010 = vmatprep.subr.mxu0 %v1058_v2  ;;  %975 = vmatpush3.msra.mxu1 %v534_v63 }
  0xa2   : > { %1011 = vmatpush3.msra.mxu0 %v536_v61  ;;  %976 = vmatprep.subr.mxu1 %v1058_v2 }
  0xa3   : > { %1012 = vmatprep.subr.mxu0 %v1058_v2  ;;  %977 = vmatpush3.msra.mxu1 %v533_v0 }
  0xa4   : > { %1013 = vmatpush3.msra.mxu0 %v535_v62  ;;  %978 = vmatprep.subr.mxu1 %v1058_v2 }
  0xa5   : > { %1014 = vmatprep.subr.mxu0 %v1058_v2  ;;  %979 = vmatpush3.msra.mxu1 %v532_v1 }
  0xa6   : > { %1015 = vmatpush3.msra.mxu0 %v534_v63  ;;  %980 = vmatprep.subr.mxu1 %v1058_v2 }
  0xa7   : > { %1016 = vmatprep.subr.mxu0 %v1058_v2  ;;  %981 = vmatpush3.msra.mxu1 %v531_v3 }
  0xa8   : > { %1017 = vmatpush3.msra.mxu0 %v533_v0  ;;  %982 = vmatprep.subr.mxu1 %v1058_v2 }
  0xa9   : > { %1018 = vmatprep.subr.mxu0 %v1058_v2  ;;  %983 = vmatpush3.msra.mxu1 %v530_v4 }
  0xaa   : > { %1019 = vmatpush3.msra.mxu0 %v532_v1  ;;  %984 = vmatprep.subr.mxu1 %v1058_v2 }
  0xab   : > { %1020 = vmatprep.subr.mxu0 %v1058_v2  ;;  %985 = vmatpush3.msra.mxu1 %v529_v5 }
  0xac   : > { %1021 = vmatpush3.msra.mxu0 %v531_v3  ;;  %986 = vmatprep.subr.mxu1 %v1058_v2 }
  0xad   : > { %1022 = vmatprep.subr.mxu0 %v1058_v2  ;;  %987 = vmatpush3.msra.mxu1 %v528_v6 }
  0xae   : > { %1023 = vmatpush3.msra.mxu0 %v530_v4  ;;  %988 = vmatprep.subr.mxu1 %v1058_v2 }
  0xaf   : > { %1024 = vmatprep.subr.mxu0 %v1058_v2  ;;  %989 = vmatpush3.msra.mxu1 %v527_v7 }
  0xb0   : > { %1025 = vmatpush3.msra.mxu0 %v529_v5  ;;  %990 = vmatprep.subr.mxu1 %v1058_v2 }
  0xb1   : > { %1026 = vmatprep.subr.mxu0 %v1058_v2  ;;  %991 = vmatpush3.msra.mxu1 %v526_v8 }
  0xb2   : > { %1027 = vmatpush3.msra.mxu0 %v528_v6  ;;  %992 = vmatprep.subr.mxu1 %v1058_v2 }
  0xb3   : > { %1028 = vmatprep.subr.mxu0 %v1058_v2  ;;  %993 = vmatpush3.msra.mxu1 %v525_v9 }
  0xb4   : > { %1029 = vmatpush3.msra.mxu0 %v527_v7  ;;  %997 = vmatprep.subr.mxu1 %v1058_v2 }
  0xb5   : > { %1030 = vmatprep.subr.mxu0 %v1058_v2 }
  0xb6   : > { %1031 = vmatpush3.msra.mxu0 %v526_v8 }
  0xb7   : > { %1032 = vmatprep.subr.mxu0 %v1058_v2 }
  0xb8   : > { %1033 = vmatpush3.msra.mxu0 %v525_v9 }
 0x153   : > { %v512_v10 = vpop.f32.mrf.mxu1 }
 0x155   : > { %v961_v11 = vpop.f32.mrf.mxu1 }
 0x159   : > { %v907_v12 = vpop.f32.mrf.mxu0 }
 0x15b   : > { %v908_v13 = vpop.f32.mrf.mxu0 }
 0x15c   : > { %v909_v14 = vadd.f32 %v908_v13, %v907_v12 }
 0x15e   : > { %v513_v15 = vadd.f32 %v909_v14, %v512_v10 }
 0x160   : > { %516 = vst [vmem:[%s280_s20] sm:$0xf] %v513_v15  ;;  %v518_v16 = vsel %vm517_vm10, %v513_v15, 0.0 }
 0x161   : > { %v519_v17 = vrot.slane %v518_v16, 4 }
 0x163   : > { %v520_v18 = vadd.f32 %v519_v17, %v518_v16 }
 0x165   : > { %v521_v19 = vrot.slane %v520_v18, 2 }
 0x167   : > { %v522_v20 = vadd.f32 %v521_v19, %v520_v18 }
 0x169   : > { %v523_v21 = vrot.slane %v522_v20, 1 }
 0x16b   : > { %v524_v22 = vadd.f32 %v523_v21, %v522_v20 }
 0x16d   : > { %995 = vmatmul.mubr.f32.vlgmr.msra.gmra.mxu1 %v524_v22 }
 0x16e   : > { %998 = vmatpush3.msra.mxu1 %v612_v23  ;;  %999 = vmatprep.mubr.msk.f32.mxu1 %vm1059_vm2, %v1058_v2 }
 0x22d   : > { %v607_v24 = vpop.f32.mrf.mxu1 }
 0x22e   : > { %v611_v25 = vmul.f32 0.015625, %v607_v24 }
 0x22f   : > { %v996_v26 = vpop.f32.mrf.mxu1 }
 0x230   : > { %1000 = vmatmul.mubr.msk.f32.vlgmr.msra.gmra.mxu1 %vm613_vm11, %v611_v25 }
 0x2f0   : > { %v683_v30 = vpop.f32.mrf.mxu1 }
 0x2f1   : > { %v690_v31 = vrot.slane %v683_v30, %v689_v29 }
 0x2f2   : > { %v1001_v32 = vpop.f32.mrf.mxu1 }
 0x2f3   : > { %v691_v33 = vsub.f32 %v513_v15, %v690_v31 }
 0x2f5   : > { %v692_v34 = vmul.f32 %v691_v33, %v691_v33 }
 0x2f7   : > { %v693_v35 = vsel %vm517_vm10, %v692_v34, 0.0 }
 0x2f8   : > { %v694_v36 = vrot.slane %v693_v35, 4 }
 0x2fa   : > { %v695_v37 = vadd.f32 %v694_v36, %v693_v35 }
 0x2fc   : > { %v696_v38 = vrot.slane %v695_v37, 2 }
 0x2fe   : > { %v697_v2 = vadd.f32 %v696_v38, %v695_v37 }
 0x300   : > { %v698_v39 = vrot.slane %v697_v2, 1 }
 0x302   : > { %v699_v40 = vadd.f32 %v698_v39, %v697_v2 }
 0x304   : > { %1035 = vmatmul.mubr.f32.vlgmr.msra.gmra.mxu0 %v699_v40 }
 0x3c4   : > { %v766_v41 = vpop.f32.mrf.mxu0 }
 0x3c5   : > { %v771_v42 = vrot.slane %v766_v41, 7 }
 0x3c6   : > { %v1036_v43 = vpop.f32.mrf.mxu0 }
 0x3c7   : > { %v774_v44 = vsel %vm773_vm12, %v607_v24, %v771_v42 }
 0x3c8   : > { %776 = vst.msk [vmem:[%s284_s27] sm:$0x3] %vm775_vm13, %v774_v44 }
 0x3c9 PF: > { %s18_s24 = sadd.s32 1, %s1056_s24  }
 0x3ca   : > { %p15_p4 = scmp.ge.s32.totalorder %s18_s24, 4  }
 0x3cc   :  { %17 = sbr.rel (!%p15_p4) target bundleno = 1 (0x1), region = 86 }

// kernel: vae_decoder_forward.5
= control target key start
LH: loop header
LB: loop body
LE: loop exit
PB: predicated region body
PF: predicated region fallthrough
CT: control target
= control target key end

     0   :  { %13 = vsyncpa [#allocation4], 0  ;;  %s1218_s24 = smov 0   ;;  %s1442_s0 = inlined_call_operand.vmem [shape: f32[2,2,64], index: 0, kind: input, shape index: {}]   ;;  %s1443_s1 = inlined_call_operand.vmem [shape: f32[1,64], index: 1, kind: input, shape index: {}]   ;;  %s1444_s2 = inlined_call_operand.vmem [shape: f32[1,64], index: 2, kind: input, shape index: {}]   ;;  %s1445_s3 = inlined_call_operand.hbm [shape: f32[384,128], index: 3, kind: input, shape index: {}]   ;;  %s1446_s4 = inlined_call_operand.vmem [shape: f32[128,16], index: 4, kind: input, shape index: {}]   ;;  %s1447_s5 = inlined_call_operand.vmem [shape: f32[16,128], index: 5, kind: input, shape index: {}]   ;;  %s1448_s6 = inlined_call_operand.vmem [shape: f32[2,2,128], index: 6, kind: output, shape index: {0}]   ;;  %s1449_s7 = inlined_call_operand.vmem [shape: f32[2,2,16], index: 7, kind: output, shape index: {1}]  }
   0x1 LB: > { %s1224_s25 = sadd.s32 4294967295, %s1170_s24   ;;  %p893_p0 = scmp.ge.s32.totalorder %s1170_s24, 1  ;;  %s1170_s24 = sphi %s1218_s24, %s19_s24  }
   0x2   : > { %p207_p1 = scmp.lt.s32.totalorder %s1170_s24, 3  ;;  %s1172_s26 = smov [#allocation3]  }
   0x3   : > { %s225_s27 = sshll.u32 %s1172_s26, 4  ;;  %p1118_p3 = scmp.eq.s32.totalorder %s1224_s25, 0  ;;  %s226_s27 = int_to_ptr.vmem [resolvable:$true] %s225_s27 }
   0x4   : > { %p1228_p2 = pnand %p893_p0, %p207_p1  ;;  %s1145_s29 = scalar_lea.vmem %s226_s27, 6144 }
   0x5   : > { %p1146_p7 = scmp.ne.s32.totalorder %s226_s27, %s1145_s29  ;;  %p1153_p10 = scmp.lt.s32.totalorder %s226_s27, %s226_s27 }
   0x6   : > { %p1114_p4 = pneg %p1228_p2  ;;  %p1154_p11 = scmp.lt.s32.totalorder %s1145_s29, %s1145_s29 }
   0x8   : > { %p1115_p5 = pnand %p1118_p3, %p1114_p4  ;;  %p1155_p12 = por %p1154_p11, %p1153_p10 }
   0xa   : > { %p1136_p6 = pneg %p1115_p5 }
   0xc   : > { %p1148_p8 = pnand %p1146_p7, %p1136_p6 }
   0xe   : > { %p1149_p9 = pneg %p1148_p8 }
  0x10   : > { %p1156_p13 = pnand %p1155_p12, %p1149_p9 }
  0x12   : > { %1159 = shalt.err (!%p1156_p13)
}
  0x13   : > { %s1173_s30 = smov 128   ;;  %s1174_s8 = smov 8  }
  0x14   : > { %1117 = dma.hbm_to_vmem [thread:$0]  (!%p1115_p5), %s1445_s3, 6144, %s226_s27, [#allocation4], %s1173_s30, %s1173_s30, %s1174_s8  }
  0x15   : > { %254 = sbr.rel (%p1228_p2) target bundleno = 983 (0x3d7), region = 44 }
  0x1a   : > { %1165 = dma.done.wait (%p1118_p3), [#allocation4], 6144  }
  0x1b   : > { %1167 = vsyncadd (%p1118_p3), [#allocation4], 4294961152  ;;  %p288_p0 = scmp.lt.s32.totalorder %s1224_s25, 1  ;;  %vm318_vm0 = vcmask 519168   ;;  %v1175_v0 = vmov 0.0   ;;  %v376_v5 = vld [vmem:[#allocation3 + $0xf8] sm:$0xff] }
  0x1c   : > { %319 = vst.msk [vmem:[#allocation2] sm:$0xf] %vm318_vm0, %v1175_v0  ;;  %998 = vmatprep.subr.mxu1 %v1175_v0  ;;  %v901_v2 = vld [vmem:[%s1443_s1] ss:$0 sm:$0xff]  ;;  %v375_v7 = vld [vmem:[#allocation3 + $0xf0] sm:$0xff]  ;;  %909 = vmatprep.subr.mxu0 %v376_v5  ;;  %v374_v11 = vld [vmem:[#allocation3 + $0xe8] sm:$0xff] }
  0x1d   : > { %s1452_s25 = smov (!%p288_p0, %s1224_s25), 1  ;;  %v902_v3 = vld [vmem:[%s1444_s2] ss:$0 sm:$0xff]  ;;  %v359_v8 = vld [vmem:[#allocation3 + $0x70] sm:$0xff]  ;;  %vm320_vm1 = vcmask 517120   ;;  %v358_v13 = vld [vmem:[#allocation3 + $0x68] sm:$0xff] }
  0x1e   : > { %s1250_s11 = sshll.u32 %s1452_s25, 1  ;;  %v360_v6 = vld [vmem:[#allocation3 + $0x78] sm:$0xff]  ;;  %v391_v12 = vld [vmem:[#allocation3 + $0x170] sm:$0xff]  ;;  %v390_v14 = vld [vmem:[#allocation3 + $0x168] sm:$0xff]  ;;  %s1176_s19 = smov 32   ;;  %vm1177_vm2 = vmmov 0  }
  0x1f   : > { %s291_s14 = scalar_lea.vmem %s1442_s0, %s1250_s11  ;;  %v392_v9 = vld [vmem:[#allocation3 + $0x178] sm:$0xff]  ;;  %910 = vmatpush3.msra.mxu0 %v360_v6  ;;  %v373_v16 = vld [vmem:[#allocation3 + $0xe0] sm:$0xff]  ;;  %v371_v22 = vld [vmem:[#allocation3 + $0xd0] sm:$0xff]  ;;  %1030 = vmatprep.mubr.msk.f32.mxu1 %vm1177_vm2, %v1175_v0  ;;  %vm337_vm3 = vcmask 261120   ;;  %vm339_vm4 = vcmask 785408   ;;  %vm534_vm5 = vcmask 1041408  }
  0x20   : > { %v300_v1 = vld [vmem:[%s291_s14] sm:$0x3]  ;;  %999 = vmatpush3.msra.mxu1 %v392_v9  ;;  %911 = vmatprep.subr.mxu0 %v375_v7  ;;  %v357_v17 = vld [vmem:[#allocation3 + $0x60] sm:$0xff]  ;;  %v355_v23 = vld [vmem:[#allocation3 + $0x50] sm:$0xff]  ;;  %s295_s14 = scalar_lea.vmem %s1448_s6, %s1250_s11  ;;  %vm631_vm6 = vcmask 130048   ;;  %vm791_vm7 = vcmask 1040384  }
  0x21   : > { %v308_v4 = vmul.f32 %v901_v2, %v300_v1  ;;  %1000 = vmatprep.subr.mxu1 %v1175_v0  ;;  %912 = vmatpush3.msra.mxu0 %v359_v8  ;;  %v389_v18 = vld [vmem:[#allocation3 + $0x160] sm:$0xff]  ;;  %v372_v19 = vld [vmem:[#allocation3 + $0xd8] sm:$0xff]  ;;  %v387_v24 = vld [vmem:[#allocation3 + $0x150] sm:$0xff]  ;;  %vm793_vm8 = vcmask 123904  }
  0x22   : > { %1001 = vmatpush3.msra.mxu1 %v391_v12  ;;  %913 = vmatprep.subr.mxu0 %v374_v11  ;;  %v356_v20 = vld [vmem:[#allocation3 + $0x58] sm:$0xff]  ;;  %v370_v25 = vld [vmem:[#allocation3 + $0xc8] sm:$0xff]  ;;  %v369_v30 = vld [vmem:[#allocation3 + $0xc0] sm:$0xff] }
  0x23   : > { %v316_v10 = vadd.f32 %v902_v3, %v308_v4  ;;  %1002 = vmatprep.subr.mxu1 %v1175_v0  ;;  %914 = vmatpush3.msra.mxu0 %v358_v13  ;;  %v388_v21 = vld [vmem:[#allocation3 + $0x158] sm:$0xff]  ;;  %v354_v26 = vld [vmem:[#allocation3 + $0x48] sm:$0xff]  ;;  %v353_v31 = vld [vmem:[#allocation3 + $0x40] sm:$0xff] }
  0x24   : > { %1003 = vmatpush3.msra.mxu1 %v390_v14  ;;  %915 = vmatprep.subr.mxu0 %v373_v16  ;;  %v386_v27 = vld [vmem:[#allocation3 + $0x148] sm:$0xff]  ;;  %v385_v32 = vld [vmem:[#allocation3 + $0x140] sm:$0xff]  ;;  %v368_v34 = vld [vmem:[#allocation3 + $0xb8] sm:$0xff] }
  0x25   : > { %v317_v15 = vmax.f32 %v316_v10, 0.0  ;;  %1004 = vmatprep.subr.mxu1 %v1175_v0  ;;  %916 = vmatpush3.msra.mxu0 %v357_v17  ;;  %v352_v35 = vld [vmem:[#allocation3 + $0x38] sm:$0xff]  ;;  %v367_v36 = vld [vmem:[#allocation3 + $0xb0] sm:$0xff]  ;;  %v366_v39 = vld [vmem:[#allocation3 + $0xa8] sm:$0xff] }
  0x26   : > { %1005 = vmatpush3.msra.mxu1 %v389_v18  ;;  %917 = vmatprep.subr.mxu0 %v372_v19  ;;  %v384_v37 = vld [vmem:[#allocation3 + $0x138] sm:$0xff]  ;;  %v351_v38 = vld [vmem:[#allocation3 + $0x30] sm:$0xff]  ;;  %v350_v41 = vld [vmem:[#allocation3 + $0x28] sm:$0xff] }
  0x27   : > { %321 = vst.msk [vmem:[#allocation2 + $0x1] sm:$0x3] %vm320_vm1, %v317_v15  ;;  %1006 = vmatprep.subr.mxu1 %v1175_v0  ;;  %918 = vmatpush3.msra.mxu0 %v356_v20  ;;  %v383_v40 = vld [vmem:[#allocation3 + $0x130] sm:$0xff]  ;;  %v365_v42 = vld [vmem:[#allocation3 + $0xa0] sm:$0xff]  ;;  %v382_v43 = vld [vmem:[#allocation3 + $0x128] sm:$0xff] }
  0x28   : > { %1007 = vmatpush3.msra.mxu1 %v388_v21  ;;  %919 = vmatprep.subr.mxu0 %v371_v22  ;;  %v349_v44 = vld [vmem:[#allocation3 + $0x20] sm:$0xff]  ;;  %v364_v45 = vld [vmem:[#allocation3 + $0x98] sm:$0xff]  ;;  %v363_v48 = vld [vmem:[#allocation3 + $0x90] sm:$0xff] }
  0x29   : > { %1008 = vmatprep.subr.mxu1 %v1175_v0  ;;  %920 = vmatpush3.msra.mxu0 %v355_v23  ;;  %v381_v46 = vld [vmem:[#allocation3 + $0x120] sm:$0xff]  ;;  %v348_v47 = vld [vmem:[#allocation3 + $0x18] sm:$0xff]  ;;  %v347_v50 = vld [vmem:[#allocation3 + $0x10] sm:$0xff] }
  0x2a   : > { %1009 = vmatpush3.msra.mxu1 %v387_v24  ;;  %921 = vmatprep.subr.mxu0 %v370_v25  ;;  %v380_v49 = vld [vmem:[#allocation3 + $0x118] sm:$0xff]  ;;  %v362_v51 = vld [vmem:[#allocation3 + $0x88] sm:$0xff]  ;;  %v379_v52 = vld [vmem:[#allocation3 + $0x110] sm:$0xff] }
  0x2b   : > { %1010 = vmatprep.subr.mxu1 %v1175_v0  ;;  %922 = vmatpush3.msra.mxu0 %v354_v26  ;;  %v346_v53 = vld [vmem:[#allocation3 + $0x8] sm:$0xff]  ;;  %v361_v54 = vld [vmem:[#allocation3 + $0x80] sm:$0xff]  ;;  %v1286_v63 = vld [vmem:[%s1446_s4 + $0x78] sm:$0xff] }
  0x2c   : > { %1011 = vmatpush3.msra.mxu1 %v386_v27  ;;  %923 = vmatprep.subr.mxu0 %v369_v30  ;;  %v378_v55 = vld [vmem:[#allocation3 + $0x108] sm:$0xff]  ;;  %v345_v56 = vld [vmem:[#allocation3] sm:$0xff]  ;;  %v1314_v5 = vld [vmem:[%s1446_s4 + $0x58] sm:$0xff] }
  0x2d   : > { %1012 = vmatprep.subr.mxu1 %v1175_v0  ;;  %924 = vmatpush3.msra.mxu0 %v353_v31  ;;  %v377_v57 = vld [vmem:[#allocation3 + $0x100] sm:$0xff]  ;;  %v1291_v2 = vld [vmem:[%s1446_s4 + $0x70] sm:$0xff]  ;;  %v1344_v9 = vld [vmem:[%s1446_s4 + $0x38] sm:$0xff] }
  0x2e   : > { %v323_v28 = vld [vmem:[#allocation2 + $0x1] sm:$0x3]  ;;  %1013 = vmatpush3.msra.mxu1 %v385_v32  ;;  %925 = vmatprep.subr.mxu0 %v368_v34  ;;  %v1300_v3 = vld [vmem:[%s1446_s4 + $0x68] sm:$0xff]  ;;  %v1321_v6 = vld [vmem:[%s1446_s4 + $0x50] sm:$0xff] }
  0x2f   : > { %v324_v29 = vld [vmem:[#allocation2 + $0x2] sm:$0x3]  ;;  %330 = vrot.lane.b32.xlu0 %v323_v28, %s1176_s19  ;;  %v322_v33 = vld [vmem:[#allocation2] sm:$0x3]  ;;  %926 = vmatpush3.msra.mxu0 %v352_v35  ;;  %v1330_v7 = vld [vmem:[%s1446_s4 + $0x48] sm:$0xff]  ;;  %v705_v35 = vlaneseq }
  0x30   : > { %334 = vrot.lane.b32.xlu1 %v324_v29, %s1176_s19  ;;  %1014 = vmatprep.subr.mxu1 %v1175_v0  ;;  %v1307_v4 = vld [vmem:[%s1446_s4 + $0x60] sm:$0xff]  ;;  %v1351_v10 = vld [vmem:[%s1446_s4 + $0x30] sm:$0xff]  ;;  %v1358_v11 = vld [vmem:[%s1446_s4 + $0x28] sm:$0xff] }
  0x31   : > { %927 = vmatprep.subr.mxu0 %v367_v36  ;;  %1015 = vmatpush3.msra.mxu1 %v384_v37  ;;  %v1337_v8 = vld [vmem:[%s1446_s4 + $0x40] sm:$0xff]  ;;  %v1372_v13 = vld [vmem:[%s1446_s4 + $0x18] sm:$0xff]  ;;  %v544_v14 = vld [vmem:[%s1446_s4 + $0x10] sm:$0xff]  ;;  %v706_v36 = vshrl.u32 %v705_v35, 7 }
  0x32   : > { %928 = vmatpush3.msra.mxu0 %v351_v38  ;;  %1016 = vmatprep.subr.mxu1 %v1175_v0  ;;  %v1365_v12 = vld [vmem:[%s1446_s4 + $0x20] sm:$0xff]  ;;  %v1382_v15 = vld [vmem:[%s1446_s4 + $0x8] sm:$0xff] }
  0x33   : > { %326 = vrot.lane.b32.xlu0 %v322_v33, %s1176_s19  ;;  %929 = vmatprep.subr.mxu0 %v366_v39  ;;  %v542_v16 = vld [vmem:[%s1446_s4] sm:$0xff]  ;;  %v630_v17 = vld [vmem:[%s1447_s5 + $0x8] sm:$0xff]  ;;  %v707_v37 = vsub.s32 0, %v706_v36  ;;  %s299_s19 = scalar_lea.vmem %s1449_s7, %s1250_s11 }
  0x34   : > { %1017 = vmatpush3.msra.mxu1 %v383_v40  ;;  %930 = vmatpush3.msra.mxu0 %v350_v41  ;;  %v629_v31 = vld [vmem:[%s1447_s5] sm:$0xff] }
  0x35   : > { %1018 = vmatprep.subr.mxu1 %v1175_v0  ;;  %931 = vmatprep.subr.mxu0 %v365_v42 }
  0x36   : > { %1019 = vmatpush3.msra.mxu1 %v382_v43  ;;  %932 = vmatpush3.msra.mxu0 %v349_v44 }
  0x37   : > { %1020 = vmatprep.subr.mxu1 %v1175_v0  ;;  %933 = vmatprep.subr.mxu0 %v364_v45 }
  0x38   : > { %1021 = vmatpush3.msra.mxu1 %v381_v46  ;;  %934 = vmatpush3.msra.mxu0 %v348_v47 }
  0x39   : > { %1022 = vmatprep.subr.mxu1 %v1175_v0  ;;  %935 = vmatprep.subr.mxu0 %v363_v48 }
  0x3a   : > { %1023 = vmatpush3.msra.mxu1 %v380_v49  ;;  %936 = vmatpush3.msra.mxu0 %v347_v50 }
  0x3b   : > { %1024 = vmatprep.subr.mxu1 %v1175_v0  ;;  %937 = vmatprep.subr.mxu0 %v362_v51 }
  0x3c   : > { %1025 = vmatpush3.msra.mxu1 %v379_v52  ;;  %938 = vmatpush3.msra.mxu0 %v346_v53 }
  0x3d   : > { %1026 = vmatprep.subr.mxu1 %v1175_v0  ;;  %939 = vmatprep.subr.mxu0 %v361_v54 }
  0x3e   : > { %1027 = vmatpush3.msra.mxu1 %v378_v55  ;;  %940 = vmatpush3.msra.mxu0 %v345_v56 }
  0x3f   : > { %1028 = vmatprep.subr.mxu1 %v1175_v0  ;;  %1033 = vmatprep.subr.mxu0 %v1175_v0 }
  0x40   : > { %1029 = vmatpush3.msra.mxu1 %v377_v57 }
  0x41   : > { %1068 = vmatprep.subr.mxu1 %v1175_v0 }
  0xa1   : > { %v331_v58 = vpop.permute.xlu0 %330 }
  0xa2   : > { %v335_v59 = vpop.permute.xlu1 %334  ;;  %v341_v60 = vsel %vm337_vm3, 0.0, %v331_v58 }
  0xa3   : > { %v343_v61 = vsel %vm337_vm3, 0.0, %v335_v59  ;;  %903 = vmatprep.mubr.msk.f32.mxu0 %vm339_vm4, %v341_v60 }
  0xa4   : > { %1031 = vmatmul.mubr.msk.f32.vlgmr.msra.gmra.mxu1 %vm339_vm4, %v343_v61 }
  0xa5   : > { %1072 = vmatprep.mubr.msk.f32.mxu1 %vm1177_vm2, %v1175_v0  ;;  %v327_v62 = vpop.permute.xlu0 %326  ;;  %1069 = vmatpush3.msra.mxu1 %v630_v17 }
  0xa6   : > { %v338_v1 = vsel %vm337_vm3, 0.0, %v327_v62  ;;  %1070 = vmatprep.subr.mxu1 %v1175_v0 }
  0xa7   : > { %904 = vmatmul.mubr.msk.f32.vlgmr.msra.gmra.mxu0 %vm339_vm4, %v338_v1  ;;  %1071 = vmatpush3.msra.mxu1 %v629_v31 }
  0xa8   : > { %1034 = vmatpush3.msra.mxu0 %v1286_v63  ;;  %1065 = vmatprep.mubr.msk.f32.mxu0 %vm1177_vm2, %v1175_v0 }
  0xa9   : > { %1035 = vmatprep.subr.mxu0 %v1175_v0  ;;  %1075 = vmatprep.subr.mxu1 %v1175_v0 }
  0xaa   : > { %1036 = vmatpush3.msra.mxu0 %v1291_v2 }
  0xab   : > { %1037 = vmatprep.subr.mxu0 %v1175_v0 }
  0xac   : > { %1038 = vmatpush3.msra.mxu0 %v1300_v3 }
  0xad   : > { %1039 = vmatprep.subr.mxu0 %v1175_v0 }
  0xae   : > { %1040 = vmatpush3.msra.mxu0 %v1307_v4 }
  0xaf   : > { %1041 = vmatprep.subr.mxu0 %v1175_v0 }
  0xb0   : > { %1042 = vmatpush3.msra.mxu0 %v1314_v5 }
  0xb1   : > { %1043 = vmatprep.subr.mxu0 %v1175_v0 }
  0xb2   : > { %1044 = vmatpush3.msra.mxu0 %v1321_v6 }
  0xb3   : > { %1045 = vmatprep.subr.mxu0 %v1175_v0 }
  0xb4   : > { %1046 = vmatpush3.msra.mxu0 %v1330_v7 }
  0xb5   : > { %1047 = vmatprep.subr.mxu0 %v1175_v0 }
  0xb6   : > { %1048 = vmatpush3.msra.mxu0 %v1337_v8 }
  0xb7   : > { %1049 = vmatprep.subr.mxu0 %v1175_v0 }
  0xb8   : > { %1050 = vmatpush3.msra.mxu0 %v1344_v9 }
  0xb9   : > { %1051 = vmatprep.subr.mxu0 %v1175_v0 }
  0xba   : > { %1052 = vmatpush3.msra.mxu0 %v1351_v10 }
  0xbb   : > { %1053 = vmatprep.subr.mxu0 %v1175_v0 }
  0xbc   : > { %1054 = vmatpush3.msra.mxu0 %v1358_v11 }
  0xbd   : > { %1055 = vmatprep.subr.mxu0 %v1175_v0 }
  0xbe   : > { %1056 = vmatpush3.msra.mxu0 %v1365_v12 }
  0xbf   : > { %1057 = vmatprep.subr.mxu0 %v1175_v0 }
  0xc0   : > { %1058 = vmatpush3.msra.mxu0 %v1372_v13 }
  0xc1   : > { %1059 = vmatprep.subr.mxu0 %v1175_v0 }
  0xc2   : > { %1060 = vmatpush3.msra.mxu0 %v544_v14 }
  0xc3   : > { %1061 = vmatprep.subr.mxu0 %v1175_v0 }
  0xc4   : > { %1062 = vmatpush3.msra.mxu0 %v1382_v15 }
  0xc5   : > { %1063 = vmatprep.subr.mxu0 %v1175_v0 }
  0xc6   : > { %1064 = vmatpush3.msra.mxu0 %v542_v16 }
 0x164   : > { %v529_v18 = vpop.f32.mrf.mxu1 }
 0x166   : > { %v1032_v19 = vpop.f32.mrf.mxu1 }
 0x167   : > { %v941_v20 = vpop.f32.mrf.mxu0 }
 0x169   : > { %v942_v21 = vpop.f32.mrf.mxu0 }
 0x16a   : > { %v943_v22 = vadd.f32 %v942_v21, %v941_v20 }
 0x16c   : > { %v530_v23 = vadd.f32 %v943_v22, %v529_v18 }
 0x16e   : > { %533 = vst [vmem:[%s295_s14] sm:$0x3] %v530_v23  ;;  %v535_v24 = vsel %vm534_vm5, %v530_v23, 0.0 }
 0x16f   : > { %v536_v25 = vrot.slane %v535_v24, 4 }
 0x171   : > { %v537_v26 = vadd.f32 %v536_v25, %v535_v24 }
 0x173   : > { %v538_v27 = vrot.slane %v537_v26, 2 }
 0x175   : > { %v539_v28 = vadd.f32 %v538_v27, %v537_v26 }
 0x177   : > { %v540_v29 = vrot.slane %v539_v28, 1 }
 0x179   : > { %v541_v30 = vadd.f32 %v540_v29, %v539_v28 }
 0x17b   : > { %1066 = vmatmul.mubr.f32.vlgmr.msra.gmra.mxu0 %v541_v30 }
 0x23b   : > { %v624_v32 = vpop.f32.mrf.mxu0 }
 0x23c   : > { %v628_v33 = vmul.f32 0.0625, %v624_v32 }
 0x23d   : > { %v1067_v34 = vpop.f32.mrf.mxu0 }
 0x23e   : > { %1073 = vmatmul.mubr.msk.f32.vlgmr.msra.gmra.mxu1 %vm631_vm6, %v628_v33 }
 0x23f   : > { %1076 = vmatpush3.msra.mxu1 %v1286_v63  ;;  %1107 = vmatprep.mubr.msk.f32.mxu1 %vm1177_vm2, %v1175_v0 }
 0x240   : > { %1077 = vmatprep.subr.mxu1 %v1175_v0 }
 0x241   : > { %1078 = vmatpush3.msra.mxu1 %v1291_v2 }
 0x242   : > { %1079 = vmatprep.subr.mxu1 %v1175_v0 }
 0x243   : > { %1080 = vmatpush3.msra.mxu1 %v1300_v3 }
 0x244   : > { %1081 = vmatprep.subr.mxu1 %v1175_v0 }
 0x245   : > { %1082 = vmatpush3.msra.mxu1 %v1307_v4 }
 0x246   : > { %1083 = vmatprep.subr.mxu1 %v1175_v0 }
 0x247   : > { %1084 = vmatpush3.msra.mxu1 %v1314_v5 }
 0x248   : > { %1085 = vmatprep.subr.mxu1 %v1175_v0 }
 0x249   : > { %1086 = vmatpush3.msra.mxu1 %v1321_v6 }
 0x24a   : > { %1087 = vmatprep.subr.mxu1 %v1175_v0 }
 0x24b   : > { %1088 = vmatpush3.msra.mxu1 %v1330_v7 }
 0x24c   : > { %1089 = vmatprep.subr.mxu1 %v1175_v0 }
 0x24d   : > { %1090 = vmatpush3.msra.mxu1 %v1337_v8 }
 0x24e   : > { %1091 = vmatprep.subr.mxu1 %v1175_v0 }
 0x24f   : > { %1092 = vmatpush3.msra.mxu1 %v1344_v9 }
 0x250   : > { %1093 = vmatprep.subr.mxu1 %v1175_v0 }
 0x251   : > { %1094 = vmatpush3.msra.mxu1 %v1351_v10 }
 0x252   : > { %1095 = vmatprep.subr.mxu1 %v1175_v0 }
 0x253   : > { %1096 = vmatpush3.msra.mxu1 %v1358_v11 }
 0x254   : > { %1097 = vmatprep.subr.mxu1 %v1175_v0 }
 0x255   : > { %1098 = vmatpush3.msra.mxu1 %v1365_v12 }
 0x256   : > { %1099 = vmatprep.subr.mxu1 %v1175_v0 }
 0x257   : > { %1100 = vmatpush3.msra.mxu1 %v1372_v13 }
 0x258   : > { %1101 = vmatprep.subr.mxu1 %v1175_v0 }
 0x259   : > { %1102 = vmatpush3.msra.mxu1 %v544_v14 }
 0x25a   : > { %1103 = vmatprep.subr.mxu1 %v1175_v0 }
 0x25b   : > { %1104 = vmatpush3.msra.mxu1 %v1382_v15 }
 0x25c   : > { %1105 = vmatprep.subr.mxu1 %v1175_v0 }
 0x25d   : > { %1106 = vmatpush3.msra.mxu1 %v542_v16 }
 0x2fe   : > { %v701_v38 = vpop.f32.mrf.mxu1 }
 0x2ff   : > { %v708_v39 = vrot.slane %v701_v38, %v707_v37 }
 0x300   : > { %v1074_v40 = vpop.f32.mrf.mxu1 }
 0x301   : > { %v709_v41 = vsub.f32 %v530_v23, %v708_v39 }
 0x303   : > { %v710_v42 = vmul.f32 %v709_v41, %v709_v41 }
 0x305   : > { %v711_v43 = vsel %vm534_vm5, %v710_v42, 0.0 }
 0x306   : > { %v712_v44 = vrot.slane %v711_v43, 4 }
 0x308   : > { %v713_v45 = vadd.f32 %v712_v44, %v711_v43 }
 0x30a   : > { %v714_v46 = vrot.slane %v713_v45, 2 }
 0x30c   : > { %v715_v47 = vadd.f32 %v714_v46, %v713_v45 }
 0x30e   : > { %v716_v48 = vrot.slane %v715_v47, 1 }
 0x310   : > { %v717_v49 = vadd.f32 %v716_v48, %v715_v47 }
 0x312   : > { %1108 = vmatmul.mubr.f32.vlgmr.msra.gmra.mxu1 %v717_v49 }
 0x3d2   : > { %v784_v0 = vpop.f32.mrf.mxu1 }
 0x3d3   : > { %v789_v50 = vrot.slane %v784_v0, 7 }
 0x3d4   : > { %v1109_v51 = vpop.f32.mrf.mxu1 }
 0x3d5   : > { %v792_v52 = vsel %vm791_vm7, %v624_v32, %v789_v50 }
 0x3d6   : > { %794 = vst.msk [vmem:[%s299_s19] sm:$0x3] %vm793_vm8, %v792_v52 }
 0x3d7 PF: > { %s19_s24 = sadd.s32 1, %s1170_s24  }
 0x3d8   : > { %p16_p1 = scmp.ge.s32.totalorder %s19_s24, 4  }
 0x3da   :  { %18 = sbr.rel (!%p16_p1) target bundleno = 1 (0x1), region = 91 }
 0x3df   :  { %828 = vsyncpa [#allocation4], 1 }
 0x3e0   :  { %830 = vsyncpa [#allocation4 + $0x1], 1 }

// kernel: vae_decoder_forward.7
= control target key start
LH: loop header
LB: loop body
LE: loop exit
PB: predicated region body
PF: predicated region fallthrough
CT: control target
= control target key end

     0   :  { %s477_s15 = smov 0   ;;  %s633_s0 = inlined_call_operand.vmem [shape: f32[2,8,64], index: 0, kind: input, shape index: {}]   ;;  %s634_s1 = inlined_call_operand.vmem [shape: f32[1,64], index: 1, kind: input, shape index: {}]   ;;  %s635_s2 = inlined_call_operand.vmem [shape: f32[1,64], index: 2, kind: input, shape index: {}]   ;;  %s636_s3 = inlined_call_operand.vmem [shape: f32[240,32], index: 3, kind: input, shape index: {}]   ;;  %s637_s4 = inlined_call_operand.vmem [shape: f32[2,8,32], index: 4, kind: output, shape index: {}]  }
   0x1 LB: > { %s411_s16 = sadd.s32 4294967295, %s446_s15   ;;  %p415_p0 = scmp.ge.s32.totalorder %s446_s15, 1  ;;  %s446_s15 = sphi %s477_s15, %s14_s15  }
   0x2   : > { %p161_p1 = scmp.lt.s32.totalorder %s446_s15, 3 }
   0x4   : > { %p162_p2 = pnand %p415_p0, %p161_p1 }
   0x5   : > { %p185_p3 = scmp.lt.s32.totalorder (!%p162_p2), %s411_s16, 1  ;;  %s449_s22 = smov (!%p162_p2), 88  }
   0x6   : > { %165 = sbr.rel (%p162_p2) target bundleno = 378 (0x17a), region = 36  ;;  %s450_s23 = smov (!%p162_p2), 40  }
   0xb   : > { %vm211_vm0 = vcmask 523264   ;;  %vm213_vm1 = vcmask 517120   ;;  %v262_v0 = vld [vmem:[%s636_s3 + $0x78] sm:$0xff]  ;;  %s639_s16 = smov (!%p185_p3, %s411_s16), 1  ;;  %v448_v1 = vmov 0.0   ;;  %v261_v2 = vld [vmem:[%s636_s3 + $0x70] sm:$0xff] }
   0xc   : > { %212 = vst.msk [vmem:[#allocation2] sm:$0xff] %vm211_vm0, %v448_v1  ;;  %281 = vmatprep.subr.mxu0 %v448_v1  ;;  %s416_s21 = sshll.u32 %s639_s16, 3  ;;  %v418_v3 = vld [vmem:[%s634_s1] ss:$0 sm:$0xff]  ;;  %v260_v4 = vld [vmem:[%s636_s3 + $0x68] sm:$0xff]  ;;  %v258_v9 = vld [vmem:[%s636_s3 + $0x58] sm:$0xff] }
   0xd   : > { %214 = vst.msk [vmem:[#allocation2 + $0x8] sm:$0x3] %vm213_vm1, %v448_v1  ;;  %282 = vmatpush1.msra.mxu0 %v262_v0  ;;  %s188_s28 = scalar_lea.vmem %s633_s0, %s416_s21  ;;  %v419_v6 = vld [vmem:[%s635_s2] ss:$0 sm:$0xff]  ;;  %v257_v11 = vld [vmem:[%s636_s3 + $0x50] sm:$0xff]  ;;  %v256_v13 = vld [vmem:[%s636_s3 + $0x48] sm:$0xff]  ;;  %s192_s20 = scalar_lea.vmem %s637_s4, %s416_s21 }
   0xe   : > { %283 = vmatprep.subr.mxu0 %v448_v1  ;;  %v193_v5 = vld [vmem:[%s188_s28] sm:$0xff]  ;;  %v254_v15 = vld [vmem:[%s636_s3 + $0x38] sm:$0xff]  ;;  %v253_v16 = vld [vmem:[%s636_s3 + $0x30] sm:$0xff]  ;;  %s451_s28 = smov 8   ;;  %vm239_vm2 = vcmask 195584   ;;  %vm241_vm3 = vcmask 261120  }
   0xf   : > { %284 = vmatpush1.msra.mxu0 %v261_v2  ;;  %v259_v7 = vld [vmem:[%s636_s3 + $0x60] sm:$0xff]  ;;  %v201_v8 = vmul.f32 %v418_v3, %v193_v5  ;;  %v252_v19 = vld [vmem:[%s636_s3 + $0x28] sm:$0xff]  ;;  %v250_v22 = vld [vmem:[%s636_s3 + $0x18] sm:$0xff]  ;;  %vm243_vm4 = vcmask 326656   ;;  %vm245_vm5 = vcmask 850944   ;;  %vm231_vm6 = vcmask 64512  }
  0x10   : > { %285 = vmatprep.subr.mxu0 %v448_v1  ;;  %v255_v14 = vld [vmem:[%s636_s3 + $0x40] sm:$0xff]  ;;  %v249_v23 = vld [vmem:[%s636_s3 + $0x10] sm:$0xff]  ;;  %v248_v24 = vld [vmem:[%s636_s3 + $0x8] sm:$0xff]  ;;  %vm277_vm7 = vcmask 916480   ;;  %vm233_vm8 = vcmask 588800   ;;  %vm235_vm9 = vcmask 654336  }
  0x11   : > { %286 = vmatpush1.msra.mxu0 %v260_v4  ;;  %v209_v10 = vadd.f32 %v419_v6, %v201_v8  ;;  %v251_v21 = vld [vmem:[%s636_s3 + $0x20] sm:$0xff]  ;;  %v276_v26 = vld [vmem:[%s636_s3 + $0xe8] sm:$0xff]  ;;  %v274_v28 = vld [vmem:[%s636_s3 + $0xd8] sm:$0xff]  ;;  %vm237_vm10 = vcmask 719872  }
  0x12   : > { %287 = vmatprep.subr.mxu0 %v448_v1  ;;  %v247_v25 = vld [vmem:[%s636_s3] sm:$0xff]  ;;  %v273_v29 = vld [vmem:[%s636_s3 + $0xd0] sm:$0xff]  ;;  %v272_v30 = vld [vmem:[%s636_s3 + $0xc8] sm:$0xff] }
  0x13   : > { %288 = vmatpush1.msra.mxu0 %v259_v7  ;;  %v210_v12 = vmax.f32 %v209_v10, 0.0  ;;  %v275_v27 = vld [vmem:[%s636_s3 + $0xe0] sm:$0xff]  ;;  %v270_v32 = vld [vmem:[%s636_s3 + $0xb8] sm:$0xff]  ;;  %v269_v33 = vld [vmem:[%s636_s3 + $0xb0] sm:$0xff] }
  0x14   : > { %289 = vmatprep.subr.mxu0 %v448_v1  ;;  %v271_v31 = vld [vmem:[%s636_s3 + $0xc0] sm:$0xff]  ;;  %v268_v34 = vld [vmem:[%s636_s3 + $0xa8] sm:$0xff]  ;;  %v266_v36 = vld [vmem:[%s636_s3 + $0x98] sm:$0xff] }
  0x15   : > { %290 = vmatpush1.msra.mxu0 %v258_v9  ;;  %215 = vst.msk [vmem:[#allocation2 + $0x1] sm:$0xff] %vm211_vm0, %v210_v12  ;;  %v267_v35 = vld [vmem:[%s636_s3 + $0xa0] sm:$0xff]  ;;  %v265_v37 = vld [vmem:[%s636_s3 + $0x90] sm:$0xff]  ;;  %v264_v38 = vld [vmem:[%s636_s3 + $0x88] sm:$0xff] }
  0x16   : > { %291 = vmatprep.subr.mxu0 %v448_v1  ;;  %v263_v39 = vld [vmem:[%s636_s3 + $0x80] sm:$0xff] }
  0x17   : > { %292 = vmatpush1.msra.mxu0 %v257_v11 }
  0x18   : > { %293 = vmatprep.subr.mxu0 %v448_v1 }
  0x19   : > { %294 = vmatpush1.msra.mxu0 %v256_v13 }
  0x1a   : > { %295 = vmatprep.subr.mxu0 %v448_v1 }
  0x1b   : > { %296 = vmatpush1.msra.mxu0 %v255_v14 }
  0x1c   : > { %297 = vmatprep.subr.mxu0 %v448_v1  ;;  %v217_v17 = vld [vmem:[#allocation2 + $0x1] sm:$0xff] }
  0x1d   : > { %298 = vmatpush1.msra.mxu0 %v254_v15  ;;  %v218_v18 = vld [vmem:[#allocation2 + $0x2] sm:$0xff]  ;;  %224 = vrot.lane.b32.xlu0 %v217_v17, %s449_s22 }
  0x1e   : > { %299 = vmatprep.subr.mxu0 %v448_v1  ;;  %228 = vrot.lane.b32.xlu1 %v218_v18, %s450_s23  ;;  %v216_v20 = vld [vmem:[#allocation2] sm:$0xff] }
  0x1f   : > { %300 = vmatpush1.msra.mxu0 %v253_v16 }
  0x20   : > { %301 = vmatprep.subr.mxu0 %v448_v1 }
  0x21   : > { %302 = vmatpush1.msra.mxu0 %v252_v19  ;;  %220 = vrot.lane.b32.xlu0 %v216_v20, %s451_s28 }
  0x22   : > { %303 = vmatprep.subr.mxu0 %v448_v1 }
  0x23   : > { %304 = vmatpush1.msra.mxu0 %v251_v21 }
  0x24   : > { %305 = vmatprep.subr.mxu0 %v448_v1 }
  0x25   : > { %306 = vmatpush1.msra.mxu0 %v250_v22 }
  0x26   : > { %307 = vmatprep.subr.mxu0 %v448_v1 }
  0x27   : > { %308 = vmatpush1.msra.mxu0 %v249_v23 }
  0x28   : > { %309 = vmatprep.subr.mxu0 %v448_v1 }
  0x29   : > { %310 = vmatpush1.msra.mxu0 %v248_v24 }
  0x2a   : > { %311 = vmatprep.subr.mxu0 %v448_v1 }
  0x2b   : > { %312 = vmatpush1.msra.mxu0 %v247_v25 }
  0x2c   : > { %317 = vmatprep.subr.mxu0 %v448_v1 }
  0x2d   : > { %318 = vmatpush2.msra.mxu0 %v276_v26 }
  0x2e   : > { %319 = vmatprep.subr.mxu0 %v448_v1 }
  0x2f   : > { %320 = vmatpush2.msra.mxu0 %v275_v27 }
  0x30   : > { %321 = vmatprep.subr.mxu0 %v448_v1 }
  0x31   : > { %322 = vmatpush2.msra.mxu0 %v274_v28 }
  0x32   : > { %323 = vmatprep.subr.mxu0 %v448_v1 }
  0x33   : > { %324 = vmatpush2.msra.mxu0 %v273_v29 }
  0x34   : > { %325 = vmatprep.subr.mxu0 %v448_v1 }
  0x35   : > { %326 = vmatpush2.msra.mxu0 %v272_v30 }
  0x36   : > { %327 = vmatprep.subr.mxu0 %v448_v1 }
  0x37   : > { %328 = vmatpush2.msra.mxu0 %v271_v31 }
  0x38   : > { %329 = vmatprep.subr.mxu0 %v448_v1 }
  0x39   : > { %330 = vmatpush2.msra.mxu0 %v270_v32 }
  0x3a   : > { %331 = vmatprep.subr.mxu0 %v448_v1 }
  0x3b   : > { %332 = vmatpush2.msra.mxu0 %v269_v33 }
  0x3c   : > { %333 = vmatprep.subr.mxu0 %v448_v1 }
  0x3d   : > { %334 = vmatpush2.msra.mxu0 %v268_v34 }
  0x3e   : > { %335 = vmatprep.subr.mxu0 %v448_v1 }
  0x3f   : > { %336 = vmatpush2.msra.mxu0 %v267_v35 }
  0x40   : > { %337 = vmatprep.subr.mxu0 %v448_v1 }
  0x41   : > { %338 = vmatpush2.msra.mxu0 %v266_v36 }
  0x42   : > { %339 = vmatprep.subr.mxu0 %v448_v1 }
  0x43   : > { %340 = vmatpush2.msra.mxu0 %v265_v37 }
  0x44   : > { %341 = vmatprep.subr.mxu0 %v448_v1 }
  0x45   : > { %342 = vmatpush2.msra.mxu0 %v264_v38 }
  0x46   : > { %343 = vmatprep.subr.mxu0 %v448_v1 }
  0x47   : > { %344 = vmatpush2.msra.mxu0 %v263_v39 }
  0x8f   : > { %v225_v40 = vpop.permute.xlu0 %224 }
  0x90   : > { %v229_v41 = vpop.permute.xlu1 %228  ;;  %v240_v42 = vsel %vm239_vm2, %v225_v40, 0.0 }
  0x91   : > { %v242_v43 = vsel %vm241_vm3, %v240_v42, 0.0 }
  0x92   : > { %v244_v44 = vsel %vm243_vm4, %v242_v43, %v229_v41 }
  0x93   : > { %v221_v45 = vpop.permute.xlu0 %220  ;;  %v246_v46 = vsel %vm245_vm5, %v244_v44, 0.0 }
  0x94   : > { %v232_v47 = vsel %vm231_vm6, 0.0, %v221_v45  ;;  %420 = vmatprep.mubr.msk.f32.mxu0 %vm277_vm7, %v246_v46 }
  0x95   : > { %v234_v48 = vsel %vm233_vm8, %v232_v47, 0.0 }
  0x96   : > { %v236_v49 = vsel %vm235_vm9, %v234_v48, 0.0 }
  0x97   : > { %v238_v50 = vsel %vm237_vm10, %v236_v49, %v225_v40 }
  0x98   : > { %346 = vmatmul.mubr.f32.vlgmr.msra.gmra.mxu0 %v238_v50 }
 0x158   : > { %v347_v51 = vpop.f32.mrf.mxu0 }
 0x159   : > { %v421_v52 = vmul.f32 -1.442695, %v347_v51 }
 0x15a   : > { %v349_v53 = vpop.f32.mrf.mxu0 }
 0x15b   : > { %436 = vpow2.f32 %v421_v52 }
 0x168   : > { %v437_v54 = vpop.eup %436 }
 0x169   : > { %v354_v55 = vadd.f32 1.0, %v437_v54 }
 0x16b   : > { %438 = vrcp.f32 %v354_v55 }
 0x178   : > { %v439_v56 = vpop.eup %438 }
 0x179   : > { %357 = vst.msk [vmem:[%s192_s20] sm:$0xff] %vm241_vm3, %v439_v56 }
 0x17a PF: > { %s14_s15 = sadd.s32 1, %s446_s15  }
 0x17b   : > { %p11_p4 = scmp.ge.s32.totalorder %s14_s15, 4  }
 0x17d   :  { %13 = sbr.rel (!%p11_p4) target bundleno = 1 (0x1), region = 66 }

</bundles_post_ra>
